<compile_context>
chip_gen: v7x
topology: tpu7x:2x2x1
jax: 0.10.0
libtpu: 0.0.40
codegen_flags: <defaults>
</compile_context>

<pallas_src>
import jax
import jax.numpy as jnp
from jax.experimental import pallas as pl
from jax.experimental.pallas import tpu as pltpu


LATENT_DIM = 20
IN_DIM = 28 * 28          # 784
HID_DIM = 400

# lane-dense padded dims (multiples of 128)
IN_P = 896                # 7 * 128
HID_P = 512               # 4 * 128
LAT_P = 128               # latent padded to one full vreg of lanes


def _round_up(x, m):
    return ((x + m - 1) // m) * m


def _pad_to(a, shape):
    pads = [(0, s - d) for d, s in zip(a.shape, shape)]
    return jnp.pad(a, pads)


def _vae_kernel(x_ref, w1_ref, b1_ref, w2_ref, b2_ref,
                w3_ref, b3_ref, w4_ref, b4_ref, eps_ref,
                recon_ref, lat_ref):
    """One batch tile: full fused VAE forward.

    x_ref   : (TB, 896) bf16      w1: (896, 512) bf16   b1: (1, 512) f32
    w2      : (512, 256) bf16 (fused fc21|fc22, mu cols [0,20), logvar cols [128,148))
    w3      : (128, 512) bf16     w4: (512, 896) bf16
    eps_ref : (TB, 128) f32 (zeros beyond lane 20)
    recon   : (TB, 896) f32       lat: (TB, 256) f32 (mu | logvar, padded)
    """
    x = x_ref[...]                                                  # (TB, 896) bf16

    # --- encode: h1 = relu(x @ W1 + b1) ---
    h1 = jnp.dot(x, w1_ref[...], preferred_element_type=jnp.float32)
    h1 = jnp.maximum(h1 + b1_ref[...], 0.0)                         # (TB, 512) f32

    # --- fused mu/logvar projection (single lane-dense matmul) ---
    y2 = jnp.dot(h1.astype(jnp.bfloat16), w2_ref[...],
                 preferred_element_type=jnp.float32) + b2_ref[...]  # (TB, 256) f32
    lat_ref[...] = y2                                               # wrapper slices mu/logvar

    mu = y2[:, :LAT_P]                                              # (TB, 128), zeros past lane 20
    logvar = y2[:, LAT_P:]                                          # (TB, 128), zeros past lane 20

    # --- reparameterize: z = mu + eps * exp(0.5 * logvar) ---
    # padded lanes: mu=0, logvar=0 -> std=1, eps=0 -> z=0 (stays consistent)
    std = jnp.exp(0.5 * logvar)
    z = mu + eps_ref[...] * std                                     # (TB, 128) f32

    # --- decode: h3 = relu(z @ W3 + b3); recon = sigmoid(h3 @ W4 + b4) ---
    h3 = jnp.dot(z.astype(jnp.bfloat16), w3_ref[...],
                 preferred_element_type=jnp.float32)
    h3 = jnp.maximum(h3 + b3_ref[...], 0.0)                         # (TB, 512) f32

    logits = jnp.dot(h3.astype(jnp.bfloat16), w4_ref[...],
                     preferred_element_type=jnp.float32) + b4_ref[...]  # (TB, 896) f32
    # reciprocal on the EUP path instead of a VALU divide
    recon_ref[...] = pl.reciprocal(1.0 + jnp.exp(-logits), approx=False)


@jax.jit
def vae_forward(x_nchw, params, eps):
    """Fused VAE forward.

    x_nchw: (B, 1, 28, 28) float32
    params: dict of weights stored transposed as (in, out), biases (1, out)
    eps:    (B, LATENT_DIM) float32 gaussian noise
    returns (recon (B, 784), mu (B, 20), logvar (B, 20))
    """
    B = x_nchw.shape[0]
    x = x_nchw.reshape(B, IN_DIM).astype(jnp.float32)

    # --- batch tiling: parallel grid over TB-row tiles ---
    TB = min(256, _round_up(B, 8))
    B_pad = _round_up(B, TB)
    G = B_pad // TB

    # --- pad + cast activations ---
    x_p = _pad_to(x, (B_pad, IN_P)).astype(jnp.bfloat16)
    eps_p = _pad_to(eps.astype(jnp.float32), (B_pad, LAT_P))

    # --- pad + cast weights (bf16 matmul operands, f32 biases) ---
    w1 = _pad_to(params["w1"], (IN_P, HID_P)).astype(jnp.bfloat16)
    b1 = _pad_to(params["b1"], (1, HID_P))

    # fused fc21/fc22: mu columns [0, 20), logvar columns [128, 148)
    w2 = jnp.zeros((HID_P, 2 * LAT_P), jnp.float32)
    w2 = w2.at[:HID_DIM, :LATENT_DIM].set(params["w21"])
    w2 = w2.at[:HID_DIM, LAT_P:LAT_P + LATENT_DIM].set(params["w22"])
    w2 = w2.astype(jnp.bfloat16)
    b2 = jnp.zeros((1, 2 * LAT_P), jnp.float32)
    b2 = b2.at[:, :LATENT_DIM].set(params["b21"])
    b2 = b2.at[:, LAT_P:LAT_P + LATENT_DIM].set(params["b22"])

    w3 = _pad_to(params["w3"], (LAT_P, HID_P)).astype(jnp.bfloat16)
    b3 = _pad_to(params["b3"], (1, HID_P))
    w4 = _pad_to(params["w4"], (HID_P, IN_P)).astype(jnp.bfloat16)
    b4 = _pad_to(params["b4"], (1, IN_P))

    args = (x_p, w1, b1, w2, b2, w3, b3, w4, b4, eps_p)

    def batch_spec(n):
        return pl.BlockSpec((TB, n), lambda i: (i, 0))

    def const_spec(shp):
        return pl.BlockSpec(shp, lambda i: tuple(0 for _ in shp))

    in_specs = [
        batch_spec(IN_P),                                   # x
        const_spec(w1.shape), const_spec(b1.shape),
        const_spec(w2.shape), const_spec(b2.shape),
        const_spec(w3.shape), const_spec(b3.shape),
        const_spec(w4.shape), const_spec(b4.shape),
        batch_spec(LAT_P),                                  # eps
    ]
    out_specs = (
        batch_spec(IN_P),                                   # recon (padded)
        batch_spec(2 * LAT_P),                              # lat = [mu | logvar] (padded)
    )
    out_shape = (
        jax.ShapeDtypeStruct((B_pad, IN_P), jnp.float32),
        jax.ShapeDtypeStruct((B_pad, 2 * LAT_P), jnp.float32),
    )

    flops = 2 * B_pad * (IN_P * HID_P + HID_P * 2 * LAT_P
                         + LAT_P * HID_P + HID_P * IN_P)
    transcendentals = B_pad * (LAT_P + IN_P)
    bytes_accessed = (sum(a.size * a.dtype.itemsize for a in args)
                      + B_pad * IN_P * 4 + B_pad * 2 * LAT_P * 4)

    recon_p, lat = pl.pallas_call(
        _vae_kernel,
        grid=(G,),
        out_shape=out_shape,
        in_specs=in_specs,
        out_specs=out_specs,
        compiler_params=pltpu.CompilerParams(
            dimension_semantics=("parallel",),
            vmem_limit_bytes=32 << 20,      # headroom for v7x's 64 MiB VMEM
        ),
        cost_estimate=pl.CostEstimate(
            flops=flops,
            transcendentals=transcendentals,
            bytes_accessed=bytes_accessed,
        ),
    )(*args)

    recon = recon_p[:B, :IN_DIM]
    mu = lat[:B, :LATENT_DIM]
    logvar = lat[:B, LAT_P:LAT_P + LATENT_DIM]
    return recon, mu, logvar


def init_params(key):
    """Deterministic parameter init matching the nn.Linear shapes.

    Weights stored transposed as (in_features, out_features) so the kernel
    computes x @ W + b.  Biases stored as (1, out).
    """
    def linear(key, fan_in, fan_out):
        kw, kb = jax.random.split(key)
        bound = 1.0 / jnp.sqrt(fan_in)
        w = jax.random.uniform(kw, (fan_in, fan_out), jnp.float32, -bound, bound)
        b = jax.random.uniform(kb, (1, fan_out), jnp.float32, -bound, bound)
        return w, b

    k1, k21, k22, k3, k4 = jax.random.split(key, 5)
    w1, b1 = linear(k1, IN_DIM, HID_DIM)
    w21, b21 = linear(k21, HID_DIM, LATENT_DIM)
    w22, b22 = linear(k22, HID_DIM, LATENT_DIM)
    w3, b3 = linear(k3, LATENT_DIM, HID_DIM)
    w4, b4 = linear(k4, HID_DIM, IN_DIM)
    return dict(w1=w1, b1=b1, w21=w21, b21=b21, w22=w22, b22=b22,
                w3=w3, b3=b3, w4=w4, b4=b4)


def vae_forward_ref(x_nchw, params, eps):
    """Pure-JAX f32 reference (mirrors the PyTorch forward exactly)."""
    B = x_nchw.shape[0]
    x = x_nchw.reshape(B, IN_DIM).astype(jnp.float32)
    h1 = jnp.maximum(x @ params["w1"] + params["b1"], 0.0)
    mu = h1 @ params["w21"] + params["b21"]
    logvar = h1 @ params["w22"] + params["b22"]
    z = mu + eps * jnp.exp(0.5 * logvar)
    h3 = jnp.maximum(z @ params["w3"] + params["b3"], 0.0)
    recon = jax.nn.sigmoid(h3 @ params["w4"] + params["b4"])
    return recon, mu, logvar


if __name__ == "__main__":
    key = jax.random.PRNGKey(0)
    k_param, k_x, k_eps = jax.random.split(key, 3)

    B = 4
    x = jax.random.uniform(k_x, (B, 1, 28, 28), jnp.float32)   # NCHW like PyTorch
    params = init_params(k_param)
    eps = jax.random.normal(k_eps, (B, LATENT_DIM), jnp.float32)

    recon, mu, logvar = vae_forward(x, params, eps)
    jax.block_until_ready((recon, mu, logvar))

    # correctness check vs f32 reference (bf16 matmul operands -> loose tol)
    r_ref, mu_ref, lv_ref = vae_forward_ref(x, params, eps)
    assert recon.shape == (B, IN_DIM)
    assert mu.shape == (B, LATENT_DIM) and logvar.shape == (B, LATENT_DIM)
    assert jnp.allclose(recon, r_ref, atol=2e-2, rtol=2e-2)
    assert jnp.allclose(mu, mu_ref, atol=2e-2, rtol=2e-2)
    assert jnp.allclose(logvar, lv_ref, atol=2e-2, rtol=2e-2)

    print("KERNEL_OK")
</pallas_src>

<mosaic_0001>
module attributes {stable_mosaic.version = 11 : i64} {
  func.func @_vae_kernel(%arg0: i32, %arg1: memref<8x896xbf16, #tpu.memory_space<vmem>>, %arg2: memref<896x512xbf16, #tpu.memory_space<vmem>>, %arg3: memref<1x512xf32, #tpu.memory_space<vmem>>, %arg4: memref<512x256xbf16, #tpu.memory_space<vmem>>, %arg5: memref<1x256xf32, #tpu.memory_space<vmem>>, %arg6: memref<128x512xbf16, #tpu.memory_space<vmem>>, %arg7: memref<1x512xf32, #tpu.memory_space<vmem>>, %arg8: memref<512x896xbf16, #tpu.memory_space<vmem>>, %arg9: memref<1x896xf32, #tpu.memory_space<vmem>>, %arg10: memref<8x128xf32, #tpu.memory_space<vmem>>, %arg11: memref<8x896xf32, #tpu.memory_space<vmem>>, %arg12: memref<8x256xf32, #tpu.memory_space<vmem>>) attributes {dimension_semantics = [#tpu.dimension_semantics<parallel>], iteration_bounds = array<i64: 1>, scalar_prefetch = 0 : i64, scratch_operands = 0 : i64, tpu.core_type = #tpu.core_type<tc>, window_params = [{transform_indices = @transform_0, window_bounds = array<i64: 8, 896>}, {pipeline_mode = #tpu.pipeline_mode<synchronous>, transform_indices = @transform_1, window_bounds = array<i64: 896, 512>}, {pipeline_mode = #tpu.pipeline_mode<synchronous>, transform_indices = @transform_2, window_bounds = array<i64: 1, 512>}, {pipeline_mode = #tpu.pipeline_mode<synchronous>, transform_indices = @transform_3, window_bounds = array<i64: 512, 256>}, {pipeline_mode = #tpu.pipeline_mode<synchronous>, transform_indices = @transform_4, window_bounds = array<i64: 1, 256>}, {pipeline_mode = #tpu.pipeline_mode<synchronous>, transform_indices = @transform_5, window_bounds = array<i64: 128, 512>}, {pipeline_mode = #tpu.pipeline_mode<synchronous>, transform_indices = @transform_6, window_bounds = array<i64: 1, 512>}, {pipeline_mode = #tpu.pipeline_mode<synchronous>, transform_indices = @transform_7, window_bounds = array<i64: 512, 896>}, {pipeline_mode = #tpu.pipeline_mode<synchronous>, transform_indices = @transform_8, window_bounds = array<i64: 1, 896>}, {transform_indices = @transform_9, window_bounds = array<i64: 8, 128>}, {transform_indices = @transform_10, window_bounds = array<i64: 8, 896>}, {transform_indices = @transform_11, window_bounds = array<i64: 8, 256>}]} {
    %c0 = arith.constant 0 : index
    %c0_0 = arith.constant 0 : index
    %0 = vector.load %arg1[%c0, %c0_0] : memref<8x896xbf16, #tpu.memory_space<vmem>>, vector<8x896xbf16>
    %c0_1 = arith.constant 0 : index
    %c0_2 = arith.constant 0 : index
    %1 = vector.load %arg2[%c0_1, %c0_2] : memref<896x512xbf16, #tpu.memory_space<vmem>>, vector<896x512xbf16>
    %cst = arith.constant dense<0.000000e+00> : vector<8x512xf32>
    %2 = tpu.matmul %0, %1, %cst {dimension_numbers = #tpu.dot_dimension_numbers<[1], [0], [0], [1], [0, 0, 1, 1], [], []>} : vector<8x896xbf16>, vector<896x512xbf16>, vector<8x512xf32> -> vector<8x512xf32>
    %c0_3 = arith.constant 0 : index
    %c0_4 = arith.constant 0 : index
    %3 = vector.load %arg3[%c0_3, %c0_4] : memref<1x512xf32, #tpu.memory_space<vmem>>, vector<1x512xf32>
    %4 = vector.broadcast %3 : vector<1x512xf32> to vector<8x512xf32>
    %5 = arith.addf %2, %4 : vector<8x512xf32>
    %cst_5 = arith.constant 0.000000e+00 : f32
    %6 = vector.broadcast %cst_5 : f32 to vector<8x512xf32>
    %7 = arith.maximumf %5, %6 : vector<8x512xf32>
    %8 = arith.truncf %7 : vector<8x512xf32> to vector<8x512xbf16>
    %c0_6 = arith.constant 0 : index
    %c0_7 = arith.constant 0 : index
    %9 = vector.load %arg4[%c0_6, %c0_7] : memref<512x256xbf16, #tpu.memory_space<vmem>>, vector<512x256xbf16>
    %cst_8 = arith.constant dense<0.000000e+00> : vector<8x256xf32>
    %10 = tpu.matmul %8, %9, %cst_8 {dimension_numbers = #tpu.dot_dimension_numbers<[1], [0], [0], [1], [0, 0, 1, 1], [], []>} : vector<8x512xbf16>, vector<512x256xbf16>, vector<8x256xf32> -> vector<8x256xf32>
    %c0_9 = arith.constant 0 : index
    %c0_10 = arith.constant 0 : index
    %11 = vector.load %arg5[%c0_9, %c0_10] : memref<1x256xf32, #tpu.memory_space<vmem>>, vector<1x256xf32>
    %12 = vector.broadcast %11 : vector<1x256xf32> to vector<8x256xf32>
    %13 = arith.addf %10, %12 : vector<8x256xf32>
    %c0_11 = arith.constant 0 : index
    %c0_12 = arith.constant 0 : index
    %14 = vector.load %arg12[%c0_11, %c0_12] : memref<8x256xf32, #tpu.memory_space<vmem>>, vector<8x256xf32>
    tpu.vector_store %arg12[%c0_11, %c0_12], %13 {strides = array<i32>} : memref<8x256xf32, #tpu.memory_space<vmem>>, vector<8x256xf32>,
    %15 = vector.extract_strided_slice %13 {offsets = [0, 0], sizes = [8, 128], strides = [1, 1]} : vector<8x256xf32> to vector<8x128xf32>
    %16 = vector.extract_strided_slice %13 {offsets = [0, 128], sizes = [8, 128], strides = [1, 1]} : vector<8x256xf32> to vector<8x128xf32>
    %cst_13 = arith.constant 5.000000e-01 : f32
    %17 = vector.broadcast %cst_13 : f32 to vector<8x128xf32>
    %18 = arith.mulf %17, %16 : vector<8x128xf32>
    %19 = math.exp %18 : vector<8x128xf32>
    %c0_14 = arith.constant 0 : index
    %c0_15 = arith.constant 0 : index
    %20 = vector.load %arg10[%c0_14, %c0_15] : memref<8x128xf32, #tpu.memory_space<vmem>>, vector<8x128xf32>
    %21 = arith.mulf %20, %19 : vector<8x128xf32>
    %22 = arith.addf %15, %21 : vector<8x128xf32>
    %23 = arith.truncf %22 : vector<8x128xf32> to vector<8x128xbf16>
    %c0_16 = arith.constant 0 : index
    %c0_17 = arith.constant 0 : index
    %24 = vector.load %arg6[%c0_16, %c0_17] : memref<128x512xbf16, #tpu.memory_space<vmem>>, vector<128x512xbf16>
    %cst_18 = arith.constant dense<0.000000e+00> : vector<8x512xf32>
    %25 = tpu.matmul %23, %24, %cst_18 {dimension_numbers = #tpu.dot_dimension_numbers<[1], [0], [0], [1], [0, 0, 1, 1], [], []>} : vector<8x128xbf16>, vector<128x512xbf16>, vector<8x512xf32> -> vector<8x512xf32>
    %c0_19 = arith.constant 0 : index
    %c0_20 = arith.constant 0 : index
    %26 = vector.load %arg7[%c0_19, %c0_20] : memref<1x512xf32, #tpu.memory_space<vmem>>, vector<1x512xf32>
    %27 = vector.broadcast %26 : vector<1x512xf32> to vector<8x512xf32>
    %28 = arith.addf %25, %27 : vector<8x512xf32>
    %cst_21 = arith.constant 0.000000e+00 : f32
    %29 = vector.broadcast %cst_21 : f32 to vector<8x512xf32>
    %30 = arith.maximumf %28, %29 : vector<8x512xf32>
    %31 = arith.truncf %30 : vector<8x512xf32> to vector<8x512xbf16>
    %c0_22 = arith.constant 0 : index
    %c0_23 = arith.constant 0 : index
    %32 = vector.load %arg8[%c0_22, %c0_23] : memref<512x896xbf16, #tpu.memory_space<vmem>>, vector<512x896xbf16>
    %cst_24 = arith.constant dense<0.000000e+00> : vector<8x896xf32>
    %33 = tpu.matmul %31, %32, %cst_24 {dimension_numbers = #tpu.dot_dimension_numbers<[1], [0], [0], [1], [0, 0, 1, 1], [], []>} : vector<8x512xbf16>, vector<512x896xbf16>, vector<8x896xf32> -> vector<8x896xf32>
    %c0_25 = arith.constant 0 : index
    %c0_26 = arith.constant 0 : index
    %34 = vector.load %arg9[%c0_25, %c0_26] : memref<1x896xf32, #tpu.memory_space<vmem>>, vector<1x896xf32>
    %35 = vector.broadcast %34 : vector<1x896xf32> to vector<8x896xf32>
    %36 = arith.addf %33, %35 : vector<8x896xf32>
    %cst_27 = arith.constant 0.000000e+00 : f32
    %37 = vector.broadcast %cst_27 : f32 to vector<8x896xf32>
    %38 = arith.subf %37, %36 : vector<8x896xf32>
    %39 = math.exp %38 : vector<8x896xf32>
    %cst_28 = arith.constant 1.000000e+00 : f32
    %40 = vector.broadcast %cst_28 : f32 to vector<8x896xf32>
    %41 = arith.addf %40, %39 : vector<8x896xf32>
    %42 = tpu.reciprocal %41 : vector<8x896xf32> -> vector<8x896xf32>
    %c0_29 = arith.constant 0 : index
    %c0_30 = arith.constant 0 : index
    %43 = vector.load %arg11[%c0_29, %c0_30] : memref<8x896xf32, #tpu.memory_space<vmem>>, vector<8x896xf32>
    tpu.vector_store %arg11[%c0_29, %c0_30], %42 {strides = array<i32>} : memref<8x896xf32, #tpu.memory_space<vmem>>, vector<8x896xf32>,
    return
  }
  func.func @transform_0(%arg0: i32) -> (i32, i32) {
    %c0_i32 = arith.constant 0 : i32
    %c0_i32_0 = arith.constant 0 : i32
    return %arg0, %c0_i32 : i32, i32
  }
  func.func @transform_1(%arg0: i32) -> (i32, i32) {
    %c0_i32 = arith.constant 0 : i32
    %c0_i32_0 = arith.constant 0 : i32
    %c0_i32_1 = arith.constant 0 : i32
    return %c0_i32, %c0_i32_0 : i32, i32
  }
  func.func @transform_2(%arg0: i32) -> (i32, i32) {
    %c0_i32 = arith.constant 0 : i32
    %c0_i32_0 = arith.constant 0 : i32
    %c0_i32_1 = arith.constant 0 : i32
    return %c0_i32, %c0_i32_0 : i32, i32
  }
  func.func @transform_3(%arg0: i32) -> (i32, i32) {
    %c0_i32 = arith.constant 0 : i32
    %c0_i32_0 = arith.constant 0 : i32
    %c0_i32_1 = arith.constant 0 : i32
    return %c0_i32, %c0_i32_0 : i32, i32
  }
  func.func @transform_4(%arg0: i32) -> (i32, i32) {
    %c0_i32 = arith.constant 0 : i32
    %c0_i32_0 = arith.constant 0 : i32
    %c0_i32_1 = arith.constant 0 : i32
    return %c0_i32, %c0_i32_0 : i32, i32
  }
  func.func @transform_5(%arg0: i32) -> (i32, i32) {
    %c0_i32 = arith.constant 0 : i32
    %c0_i32_0 = arith.constant 0 : i32
    %c0_i32_1 = arith.constant 0 : i32
    return %c0_i32, %c0_i32_0 : i32, i32
  }
  func.func @transform_6(%arg0: i32) -> (i32, i32) {
    %c0_i32 = arith.constant 0 : i32
    %c0_i32_0 = arith.constant 0 : i32
    %c0_i32_1 = arith.constant 0 : i32
    return %c0_i32, %c0_i32_0 : i32, i32
  }
  func.func @transform_7(%arg0: i32) -> (i32, i32) {
    %c0_i32 = arith.constant 0 : i32
    %c0_i32_0 = arith.constant 0 : i32
    %c0_i32_1 = arith.constant 0 : i32
    return %c0_i32, %c0_i32_0 : i32, i32
  }
  func.func @transform_8(%arg0: i32) -> (i32, i32) {
    %c0_i32 = arith.constant 0 : i32
    %c0_i32_0 = arith.constant 0 : i32
    %c0_i32_1 = arith.constant 0 : i32
    return %c0_i32, %c0_i32_0 : i32, i32
  }
  func.func @transform_9(%arg0: i32) -> (i32, i32) {
    %c0_i32 = arith.constant 0 : i32
    %c0_i32_0 = arith.constant 0 : i32
    return %arg0, %c0_i32 : i32, i32
  }
  func.func @transform_10(%arg0: i32) -> (i32, i32) {
    %c0_i32 = arith.constant 0 : i32
    %c0_i32_0 = arith.constant 0 : i32
    return %arg0, %c0_i32 : i32, i32
  }
  func.func @transform_11(%arg0: i32) -> (i32, i32) {
    %c0_i32 = arith.constant 0 : i32
    %c0_i32_0 = arith.constant 0 : i32
    return %arg0, %c0_i32 : i32, i32
  }
}

</mosaic_0001>

<bundles_post_ra>
// kernel: vae_forward.1
= control target key start
LH: loop header
LB: loop body
LE: loop exit
PB: predicated region body
PF: predicated region fallthrough
CT: control target
= control target key end

     0   :  { %s7711_s1 = inlined_call_operand.vmem [shape: bf16[896,512], index: 1, kind: input, shape index: {}]   ;;  %s7712_s0 = inlined_call_operand.vmem [shape: bf16[8,896], index: 0, kind: input, shape index: {}]   ;;  %s7713_s3 = inlined_call_operand.vmem [shape: bf16[512,256], index: 3, kind: input, shape index: {}]   ;;  %s7714_s5 = inlined_call_operand.vmem [shape: bf16[128,512], index: 5, kind: input, shape index: {}]   ;;  %s7715_s2 = inlined_call_operand.vmem [shape: f32[1,512], index: 2, kind: input, shape index: {}]   ;;  %s7716_s7 = inlined_call_operand.vmem [shape: bf16[512,896], index: 7, kind: input, shape index: {}]   ;;  %s7717_s4 = inlined_call_operand.vmem [shape: f32[1,256], index: 4, kind: input, shape index: {}]   ;;  %s7718_s11 = inlined_call_operand.vmem [shape: f32[8,256], index: 11, kind: output, shape index: {1}]   ;;  %s7719_s9 = inlined_call_operand.vmem [shape: f32[8,128], index: 9, kind: input, shape index: {}]   ;;  %s7720_s6 = inlined_call_operand.vmem [shape: f32[1,512], index: 6, kind: input, shape index: {}]   ;;  %s7721_s8 = inlined_call_operand.vmem [shape: f32[1,896], index: 8, kind: input, shape index: {}]   ;;  %s7722_s10 = inlined_call_operand.vmem [shape: f32[8,896], index: 10, kind: output, shape index: {0}]  }
   0x1   :  { %v5029_v0 = vld [vmem:[%s7711_s1 + $0x4] ss:$16 sps:$4 sm:$0xff]   ;;  %v5031_v1 = vld [vmem:[%s7711_s1 + $0xc] ss:$16 sps:$4 sm:$0xff]   ;;  %v5033_v2 = vld [vmem:[%s7711_s1] ss:$16 sps:$4 sm:$0xff]  }
   0x2   :  { %1433 = vmatprep.subr.bf16.mxu0 %v5029_v0  ;;  %v5034_v3 = vld [vmem:[%s7711_s1 + $0x8] ss:$16 sps:$4 sm:$0xff]   ;;  %1597 = vmatprep.subr.bf16.mxu1 %v5031_v1  ;;  %v5035_v4 = vld [vmem:[%s7711_s1 + $0x24] ss:$16 sps:$4 sm:$0xff]   ;;  %v5037_v5 = vld [vmem:[%s7711_s1 + $0x2c] ss:$16 sps:$4 sm:$0xff]  }
   0x3   :  { %1434 = vmatpush1.bf16.msra.mxu0 %v5033_v2  ;;  %1598 = vmatpush1.bf16.msra.mxu1 %v5034_v3  ;;  %v5039_v6 = vld [vmem:[%s7711_s1 + $0x20] ss:$16 sps:$4 sm:$0xff]   ;;  %v5040_v7 = vld [vmem:[%s7711_s1 + $0x28] ss:$16 sps:$4 sm:$0xff]   ;;  %v5041_v8 = vld [vmem:[%s7711_s1 + $0x44] ss:$16 sps:$4 sm:$0xff]  }
   0x4   :  { %1435 = vmatprep.subr.bf16.mxu0 %v5035_v4  ;;  %1599 = vmatprep.subr.bf16.mxu1 %v5037_v5  ;;  %v5043_v9 = vld [vmem:[%s7711_s1 + $0x4c] ss:$16 sps:$4 sm:$0xff]   ;;  %v5045_v10 = vld [vmem:[%s7711_s1 + $0x40] ss:$16 sps:$4 sm:$0xff]   ;;  %v5046_v11 = vld [vmem:[%s7711_s1 + $0x48] ss:$16 sps:$4 sm:$0xff]  }
   0x5   :  { %v5047_v12 = vld [vmem:[%s7711_s1 + $0x64] ss:$16 sps:$4 sm:$0xff]   ;;  %v5049_v13 = vld [vmem:[%s7711_s1 + $0x6c] ss:$16 sps:$4 sm:$0xff]   ;;  %v5051_v14 = vld [vmem:[%s7711_s1 + $0x60] ss:$16 sps:$4 sm:$0xff]  }
   0x6   :  { %v5052_v15 = vld [vmem:[%s7711_s1 + $0x68] ss:$16 sps:$4 sm:$0xff]   ;;  %v5053_v16 = vld [vmem:[%s7711_s1 + $0x84] ss:$16 sps:$4 sm:$0xff]   ;;  %v5055_v17 = vld [vmem:[%s7711_s1 + $0x8c] ss:$16 sps:$4 sm:$0xff]  }
   0x7   :  { %1436 = vmatpush1.bf16.msra.mxu0 %v5039_v6  ;;  %1600 = vmatpush1.bf16.msra.mxu1 %v5040_v7  ;;  %v5057_v18 = vld [vmem:[%s7711_s1 + $0x80] ss:$16 sps:$4 sm:$0xff]   ;;  %v5058_v19 = vld [vmem:[%s7711_s1 + $0x88] ss:$16 sps:$4 sm:$0xff]   ;;  %v5059_v20 = vld [vmem:[%s7711_s1 + $0xa4] ss:$16 sps:$4 sm:$0xff]  }
   0x8   :  { %1437 = vmatprep.subr.bf16.mxu0 %v5041_v8  ;;  %1601 = vmatprep.subr.bf16.mxu1 %v5043_v9  ;;  %v5061_v21 = vld [vmem:[%s7711_s1 + $0xac] ss:$16 sps:$4 sm:$0xff]   ;;  %v5063_v22 = vld [vmem:[%s7711_s1 + $0xa0] ss:$16 sps:$4 sm:$0xff]   ;;  %v5064_v23 = vld [vmem:[%s7711_s1 + $0xa8] ss:$16 sps:$4 sm:$0xff]  }
   0x9   :  { %v5065_v24 = vld [vmem:[%s7711_s1 + $0xc4] ss:$16 sps:$4 sm:$0xff]   ;;  %v5067_v25 = vld [vmem:[%s7711_s1 + $0xcc] ss:$16 sps:$4 sm:$0xff]   ;;  %v5069_v26 = vld [vmem:[%s7711_s1 + $0xc0] ss:$16 sps:$4 sm:$0xff]  }
   0xa   :  { %v5070_v27 = vld [vmem:[%s7711_s1 + $0xc8] ss:$16 sps:$4 sm:$0xff]   ;;  %v5071_v28 = vld [vmem:[%s7711_s1 + $0xe4] ss:$16 sps:$4 sm:$0xff]   ;;  %v5073_v29 = vld [vmem:[%s7711_s1 + $0xec] ss:$16 sps:$4 sm:$0xff]  }
   0xb   :  { %1438 = vmatpush1.bf16.msra.mxu0 %v5045_v10  ;;  %1602 = vmatpush1.bf16.msra.mxu1 %v5046_v11  ;;  %v5075_v30 = vld [vmem:[%s7711_s1 + $0xe0] ss:$16 sps:$4 sm:$0xff]   ;;  %v5076_v31 = vld [vmem:[%s7711_s1 + $0xe8] ss:$16 sps:$4 sm:$0xff]   ;;  %v5077_v32 = vld [vmem:[%s7711_s1 + $0x104] ss:$16 sps:$4 sm:$0xff]  }
   0xc   :  { %1439 = vmatprep.subr.bf16.mxu0 %v5047_v12  ;;  %1603 = vmatprep.subr.bf16.mxu1 %v5049_v13  ;;  %v5079_v33 = vld [vmem:[%s7711_s1 + $0x10c] ss:$16 sps:$4 sm:$0xff]   ;;  %v5081_v34 = vld [vmem:[%s7711_s1 + $0x100] ss:$16 sps:$4 sm:$0xff]   ;;  %v5082_v35 = vld [vmem:[%s7711_s1 + $0x108] ss:$16 sps:$4 sm:$0xff]  }
   0xd   :  { %v5083_v36 = vld [vmem:[%s7711_s1 + $0x124] ss:$16 sps:$4 sm:$0xff]   ;;  %v5085_v37 = vld [vmem:[%s7711_s1 + $0x12c] ss:$16 sps:$4 sm:$0xff]   ;;  %v5087_v38 = vld [vmem:[%s7711_s1 + $0x120] ss:$16 sps:$4 sm:$0xff]  }
   0xe   :  { %v5088_v39 = vld [vmem:[%s7711_s1 + $0x128] ss:$16 sps:$4 sm:$0xff]   ;;  %v5089_v40 = vld [vmem:[%s7711_s1 + $0x144] ss:$16 sps:$4 sm:$0xff]   ;;  %v5091_v41 = vld [vmem:[%s7711_s1 + $0x14c] ss:$16 sps:$4 sm:$0xff]  }
   0xf   :  { %1440 = vmatpush1.bf16.msra.mxu0 %v5051_v14  ;;  %1604 = vmatpush1.bf16.msra.mxu1 %v5052_v15  ;;  %v5093_v42 = vld [vmem:[%s7711_s1 + $0x140] ss:$16 sps:$4 sm:$0xff]   ;;  %v5094_v43 = vld [vmem:[%s7711_s1 + $0x148] ss:$16 sps:$4 sm:$0xff]   ;;  %v5095_v44 = vld [vmem:[%s7711_s1 + $0x164] ss:$16 sps:$4 sm:$0xff]  }
  0x10   :  { %1441 = vmatprep.subr.bf16.mxu0 %v5053_v16  ;;  %1605 = vmatprep.subr.bf16.mxu1 %v5055_v17  ;;  %v5097_v45 = vld [vmem:[%s7711_s1 + $0x16c] ss:$16 sps:$4 sm:$0xff]   ;;  %v38_v46 = vld [vmem:[%s7712_s0] sm:$0xff]  ;;  %v5100_v49 = vld [vmem:[%s7711_s1 + $0x168] ss:$16 sps:$4 sm:$0xff]  }
  0x11   :  { %v5099_v47 = vld [vmem:[%s7711_s1 + $0x160] ss:$16 sps:$4 sm:$0xff]   ;;  %v4382_v48 = vcombine.high %v38_v46, %v38_v46  ;;  %v5101_v50 = vld [vmem:[%s7711_s1 + $0x184] ss:$16 sps:$4 sm:$0xff]   ;;  %v5103_v51 = vld [vmem:[%s7711_s1 + $0x18c] ss:$16 sps:$4 sm:$0xff]   ;;  %v4381_v4 = vcombine.low %v38_v46, %v38_v46 }
  0x12   :  { %v5105_v52 = vld [vmem:[%s7711_s1 + $0x180] ss:$16 sps:$4 sm:$0xff]   ;;  %v5106_v53 = vld [vmem:[%s7711_s1 + $0x188] ss:$16 sps:$4 sm:$0xff]   ;;  %v5107_v54 = vld [vmem:[%s7711_s1 + $0x1a4] ss:$16 sps:$4 sm:$0xff]  }
  0x13   :  { %1442 = vmatpush1.bf16.msra.mxu0 %v5057_v18  ;;  %1606 = vmatpush1.bf16.msra.mxu1 %v5058_v19  ;;  %v5109_v55 = vld [vmem:[%s7711_s1 + $0x1ac] ss:$16 sps:$4 sm:$0xff]   ;;  %v5111_v56 = vld [vmem:[%s7711_s1 + $0x1a0] ss:$16 sps:$4 sm:$0xff]   ;;  %v5112_v57 = vld [vmem:[%s7711_s1 + $0x1a8] ss:$16 sps:$4 sm:$0xff]  }
  0x14   :  { %1443 = vmatprep.subr.bf16.mxu0 %v5059_v20  ;;  %1607 = vmatprep.subr.bf16.mxu1 %v5061_v21  ;;  %v5113_v58 = vld [vmem:[%s7711_s1 + $0x1c4] ss:$16 sps:$4 sm:$0xff]   ;;  %v5115_v59 = vld [vmem:[%s7711_s1 + $0x1cc] ss:$16 sps:$4 sm:$0xff]   ;;  %v5117_v60 = vld [vmem:[%s7711_s1 + $0x1c0] ss:$16 sps:$4 sm:$0xff]  }
  0x15   :  { %1465 = vmatprep.mubr.bf16.mxu0 %v4382_v48  ;;  %1629 = vmatprep.mubr.bf16.mxu1 %v4382_v48  ;;  %v5118_v61 = vld [vmem:[%s7711_s1 + $0x1c8] ss:$16 sps:$4 sm:$0xff]   ;;  %v5119_v62 = vld [vmem:[%s7711_s1 + $0x1e4] ss:$16 sps:$4 sm:$0xff]   ;;  %v5121_v63 = vld [vmem:[%s7711_s1 + $0x1ec] ss:$16 sps:$4 sm:$0xff]  }
  0x16   :  { %v5123_v0 = vld [vmem:[%s7711_s1 + $0x1e0] ss:$16 sps:$4 sm:$0xff]   ;;  %v5124_v1 = vld [vmem:[%s7711_s1 + $0x1e8] ss:$16 sps:$4 sm:$0xff]   ;;  %v5129_v2 = vld [vmem:[%s7711_s1 + $0x204] ss:$16 sps:$4 sm:$0xff]  }
  0x17   :  { %1444 = vmatpush1.bf16.msra.mxu0 %v5063_v22  ;;  %1608 = vmatpush1.bf16.msra.mxu1 %v5064_v23  ;;  %v5132_v3 = vld [vmem:[%s7711_s1 + $0x20c] ss:$16 sps:$4 sm:$0xff]   ;;  %v5127_v5 = vld [vmem:[%s7711_s1 + $0x200] ss:$16 sps:$4 sm:$0xff]   ;;  %v5130_v6 = vld [vmem:[%s7711_s1 + $0x208] ss:$16 sps:$4 sm:$0xff]  }
  0x18   :  { %1445 = vmatprep.subr.bf16.mxu0 %v5065_v24  ;;  %1609 = vmatprep.subr.bf16.mxu1 %v5067_v25  ;;  %v5135_v7 = vld [vmem:[%s7711_s1 + $0x224] ss:$16 sps:$4 sm:$0xff]   ;;  %v5138_v8 = vld [vmem:[%s7711_s1 + $0x22c] ss:$16 sps:$4 sm:$0xff]   ;;  %v5133_v9 = vld [vmem:[%s7711_s1 + $0x220] ss:$16 sps:$4 sm:$0xff]  }
  0x19   :  { %v5136_v10 = vld [vmem:[%s7711_s1 + $0x228] ss:$16 sps:$4 sm:$0xff]   ;;  %v5141_v11 = vld [vmem:[%s7711_s1 + $0x244] ss:$16 sps:$4 sm:$0xff]   ;;  %v5144_v12 = vld [vmem:[%s7711_s1 + $0x24c] ss:$16 sps:$4 sm:$0xff]  }
  0x1a   :  { %v5139_v13 = vld [vmem:[%s7711_s1 + $0x240] ss:$16 sps:$4 sm:$0xff]   ;;  %v5142_v14 = vld [vmem:[%s7711_s1 + $0x248] ss:$16 sps:$4 sm:$0xff]   ;;  %v5147_v15 = vld [vmem:[%s7711_s1 + $0x264] ss:$16 sps:$4 sm:$0xff]  }
  0x1b   :  { %1446 = vmatpush1.bf16.msra.mxu0 %v5069_v26  ;;  %1610 = vmatpush1.bf16.msra.mxu1 %v5070_v27  ;;  %v5150_v16 = vld [vmem:[%s7711_s1 + $0x26c] ss:$16 sps:$4 sm:$0xff]   ;;  %v5145_v17 = vld [vmem:[%s7711_s1 + $0x260] ss:$16 sps:$4 sm:$0xff]   ;;  %v5148_v18 = vld [vmem:[%s7711_s1 + $0x268] ss:$16 sps:$4 sm:$0xff]  }
  0x1c   :  { %1447 = vmatprep.subr.bf16.mxu0 %v5071_v28  ;;  %1611 = vmatprep.subr.bf16.mxu1 %v5073_v29  ;;  %v5153_v19 = vld [vmem:[%s7711_s1 + $0x284] ss:$16 sps:$4 sm:$0xff]   ;;  %v5156_v20 = vld [vmem:[%s7711_s1 + $0x28c] ss:$16 sps:$4 sm:$0xff]   ;;  %v5151_v21 = vld [vmem:[%s7711_s1 + $0x280] ss:$16 sps:$4 sm:$0xff]  }
  0x1d   :  { %v5154_v22 = vld [vmem:[%s7711_s1 + $0x288] ss:$16 sps:$4 sm:$0xff]   ;;  %v5159_v23 = vld [vmem:[%s7711_s1 + $0x2a4] ss:$16 sps:$4 sm:$0xff]   ;;  %v5162_v24 = vld [vmem:[%s7711_s1 + $0x2ac] ss:$16 sps:$4 sm:$0xff]  }
  0x1e   :  { %v5157_v25 = vld [vmem:[%s7711_s1 + $0x2a0] ss:$16 sps:$4 sm:$0xff]   ;;  %v5160_v26 = vld [vmem:[%s7711_s1 + $0x2a8] ss:$16 sps:$4 sm:$0xff]   ;;  %v5165_v27 = vld [vmem:[%s7711_s1 + $0x2c4] ss:$16 sps:$4 sm:$0xff]  }
  0x1f   :  { %1448 = vmatpush1.bf16.msra.mxu0 %v5075_v30  ;;  %1612 = vmatpush1.bf16.msra.mxu1 %v5076_v31  ;;  %v5168_v28 = vld [vmem:[%s7711_s1 + $0x2cc] ss:$16 sps:$4 sm:$0xff]   ;;  %v5163_v31 = vld [vmem:[%s7711_s1 + $0x2c0] ss:$16 sps:$4 sm:$0xff]   ;;  %v5190_v48 = vld [vmem:[%s7711_s1 + $0x348] ss:$16 sps:$4 sm:$0xff]  }
  0x20   :  { %1449 = vmatprep.subr.bf16.mxu0 %v5077_v32  ;;  %1613 = vmatprep.subr.bf16.mxu1 %v5079_v33  ;;  %v6203_v29 = vld [vmem:[%s7712_s0 + $0x8] sm:$0xff]  ;;  %v5171_v33 = vld [vmem:[%s7711_s1 + $0x2e4] ss:$16 sps:$4 sm:$0xff]  }
  0x21   :  { %v4384_v30 = vcombine.high %v6203_v29, %v6203_v29  ;;  %v5166_v32 = vld [vmem:[%s7711_s1 + $0x2c8] ss:$16 sps:$4 sm:$0xff]   ;;  %v5192_v46 = vld [vmem:[%s7711_s1 + $0x34c] ss:$16 sps:$4 sm:$0xff]  }
  0x23   :  { %1450 = vmatpush1.bf16.msra.mxu0 %v5081_v34  ;;  %1614 = vmatpush1.bf16.msra.mxu1 %v5082_v35  ;;  %v5174_v34 = vld [vmem:[%s7711_s1 + $0x2ec] ss:$16 sps:$4 sm:$0xff]   ;;  %v5169_v35 = vld [vmem:[%s7711_s1 + $0x2e0] ss:$16 sps:$4 sm:$0xff]  }
  0x24   :  { %1451 = vmatprep.subr.bf16.mxu0 %v5083_v36  ;;  %1615 = vmatprep.subr.bf16.mxu1 %v5085_v37  ;;  %v5172_v36 = vld [vmem:[%s7711_s1 + $0x2e8] ss:$16 sps:$4 sm:$0xff]   ;;  %v5177_v37 = vld [vmem:[%s7711_s1 + $0x304] ss:$16 sps:$4 sm:$0xff]  }
  0x27   :  { %1452 = vmatpush1.bf16.msra.mxu0 %v5087_v38  ;;  %1616 = vmatpush1.bf16.msra.mxu1 %v5088_v39  ;;  %v5180_v38 = vld [vmem:[%s7711_s1 + $0x30c] ss:$16 sps:$4 sm:$0xff]   ;;  %v5175_v39 = vld [vmem:[%s7711_s1 + $0x300] ss:$16 sps:$4 sm:$0xff]  }
  0x28   :  { %1453 = vmatprep.subr.bf16.mxu0 %v5089_v40  ;;  %1617 = vmatprep.subr.bf16.mxu1 %v5091_v41  ;;  %v5178_v40 = vld [vmem:[%s7711_s1 + $0x308] ss:$16 sps:$4 sm:$0xff]   ;;  %v5183_v41 = vld [vmem:[%s7711_s1 + $0x324] ss:$16 sps:$4 sm:$0xff]  }
  0x2b   :  { %1454 = vmatpush1.bf16.msra.mxu0 %v5093_v42  ;;  %1618 = vmatpush1.bf16.msra.mxu1 %v5094_v43  ;;  %v5186_v42 = vld [vmem:[%s7711_s1 + $0x32c] ss:$16 sps:$4 sm:$0xff]   ;;  %v5181_v43 = vld [vmem:[%s7711_s1 + $0x320] ss:$16 sps:$4 sm:$0xff]  }
  0x2c   :  { %1455 = vmatprep.subr.bf16.mxu0 %v5095_v44  ;;  %1619 = vmatprep.subr.bf16.mxu1 %v5097_v45  ;;  %v5184_v44 = vld [vmem:[%s7711_s1 + $0x328] ss:$16 sps:$4 sm:$0xff]   ;;  %v5189_v45 = vld [vmem:[%s7711_s1 + $0x344] ss:$16 sps:$4 sm:$0xff]  }
  0x2f   :  { %1456 = vmatpush1.bf16.msra.mxu0 %v5099_v47  ;;  %1620 = vmatpush1.bf16.msra.mxu1 %v5100_v49  ;;  %v5187_v47 = vld [vmem:[%s7711_s1 + $0x340] ss:$16 sps:$4 sm:$0xff]   ;;  %v5195_v49 = vld [vmem:[%s7711_s1 + $0x364] ss:$16 sps:$4 sm:$0xff]  }
  0x30   :  { %1457 = vmatprep.subr.bf16.mxu0 %v5101_v50  ;;  %1621 = vmatprep.subr.bf16.mxu1 %v5103_v51  ;;  %v5198_v50 = vld [vmem:[%s7711_s1 + $0x36c] ss:$16 sps:$4 sm:$0xff]   ;;  %v5193_v51 = vld [vmem:[%s7711_s1 + $0x360] ss:$16 sps:$4 sm:$0xff]  }
  0x33   :  { %1458 = vmatpush1.bf16.msra.mxu0 %v5105_v52  ;;  %1622 = vmatpush1.bf16.msra.mxu1 %v5106_v53  ;;  %v5196_v52 = vld [vmem:[%s7711_s1 + $0x368] ss:$16 sps:$4 sm:$0xff]   ;;  %v5201_v53 = vld [vmem:[%s7711_s1 + $0x384] ss:$16 sps:$4 sm:$0xff]  }
  0x34   :  { %1459 = vmatprep.subr.bf16.mxu0 %v5107_v54  ;;  %1623 = vmatprep.subr.bf16.mxu1 %v5109_v55  ;;  %v5204_v54 = vld [vmem:[%s7711_s1 + $0x38c] ss:$16 sps:$4 sm:$0xff]   ;;  %v5199_v55 = vld [vmem:[%s7711_s1 + $0x380] ss:$16 sps:$4 sm:$0xff]  }
  0x37   :  { %1460 = vmatpush1.bf16.msra.mxu0 %v5111_v56  ;;  %1624 = vmatpush1.bf16.msra.mxu1 %v5112_v57  ;;  %v5202_v56 = vld [vmem:[%s7711_s1 + $0x388] ss:$16 sps:$4 sm:$0xff]   ;;  %v5207_v57 = vld [vmem:[%s7711_s1 + $0x3a4] ss:$16 sps:$4 sm:$0xff]  }
  0x38   :  { %1461 = vmatprep.subr.bf16.mxu0 %v5113_v58  ;;  %1625 = vmatprep.subr.bf16.mxu1 %v5115_v59  ;;  %v5210_v58 = vld [vmem:[%s7711_s1 + $0x3ac] ss:$16 sps:$4 sm:$0xff]   ;;  %v5205_v59 = vld [vmem:[%s7711_s1 + $0x3a0] ss:$16 sps:$4 sm:$0xff]  }
  0x3b   :  { %1462 = vmatpush1.bf16.msra.mxu0 %v5117_v60  ;;  %1626 = vmatpush1.bf16.msra.mxu1 %v5118_v61  ;;  %v5208_v60 = vld [vmem:[%s7711_s1 + $0x3a8] ss:$16 sps:$4 sm:$0xff]   ;;  %v5213_v61 = vld [vmem:[%s7711_s1 + $0x3c4] ss:$16 sps:$4 sm:$0xff]  }
  0x3c   :  { %1463 = vmatprep.subr.bf16.mxu0 %v5119_v62  ;;  %1627 = vmatprep.subr.bf16.mxu1 %v5121_v63  ;;  %v5216_v62 = vld [vmem:[%s7711_s1 + $0x3cc] ss:$16 sps:$4 sm:$0xff]   ;;  %v5211_v63 = vld [vmem:[%s7711_s1 + $0x3c0] ss:$16 sps:$4 sm:$0xff]  }
  0x3f   :  { %1464 = vmatpush1.bf16.msra.mxu0 %v5123_v0  ;;  %1628 = vmatpush1.bf16.msra.mxu1 %v5124_v1  ;;  %v5214_v0 = vld [vmem:[%s7711_s1 + $0x3c8] ss:$16 sps:$4 sm:$0xff]   ;;  %v5219_v1 = vld [vmem:[%s7711_s1 + $0x3e4] ss:$16 sps:$4 sm:$0xff]  }
  0x40   :  { %1474 = vmatprep.subr.bf16.mxu0 %v5129_v2  ;;  %1638 = vmatprep.subr.bf16.mxu1 %v5132_v3  ;;  %v5222_v2 = vld [vmem:[%s7711_s1 + $0x3ec] ss:$16 sps:$4 sm:$0xff]   ;;  %v5217_v3 = vld [vmem:[%s7711_s1 + $0x3e0] ss:$16 sps:$4 sm:$0xff]  }
  0x42   :  { %1466 = vmatmul.mubr.bf16.vlgmr.msra.gmra.mrb[0].mxu0 %v4381_v4  ;;  %1630 = vmatmul.mubr.bf16.vlgmr.msra.gmra.mrb[0].mxu1 %v4381_v4  ;;  %v5220_v4 = vld [vmem:[%s7711_s1 + $0x3e8] ss:$16 sps:$4 sm:$0xff]  }
  0x43   :  { %1475 = vmatpush1.bf16.msra.mxu0 %v5127_v5  ;;  %1639 = vmatpush1.bf16.msra.mxu1 %v5130_v6  ;;  %v5227_v5 = vld [vmem:[%s7711_s1 + $0x404] ss:$16 sps:$4 sm:$0xff]   ;;  %v5230_v6 = vld [vmem:[%s7711_s1 + $0x40c] ss:$16 sps:$4 sm:$0xff]  }
  0x44   :  { %1476 = vmatprep.subr.bf16.mxu0 %v5135_v7  ;;  %1640 = vmatprep.subr.bf16.mxu1 %v5138_v8  ;;  %v4383_v7 = vcombine.low %v6203_v29, %v6203_v29  ;;  %v5225_v8 = vld [vmem:[%s7711_s1 + $0x400] ss:$16 sps:$4 sm:$0xff]   ;;  %v5260_v29 = vld [vmem:[%s7711_s1 + $0x4ac] ss:$16 sps:$4 sm:$0xff]  }
  0x45   :  { %1506 = vmatprep.mubr.bf16.mxu0 %v4384_v30  ;;  %1670 = vmatprep.mubr.bf16.mxu1 %v4384_v30  ;;  %v5255_v30 = vld [vmem:[%s7711_s1 + $0x4a0] ss:$16 sps:$4 sm:$0xff]  }
  0x47   :  { %1477 = vmatpush1.bf16.msra.mxu0 %v5133_v9  ;;  %1641 = vmatpush1.bf16.msra.mxu1 %v5136_v10  ;;  %v5228_v9 = vld [vmem:[%s7711_s1 + $0x408] ss:$16 sps:$4 sm:$0xff]   ;;  %v5233_v10 = vld [vmem:[%s7711_s1 + $0x424] ss:$16 sps:$4 sm:$0xff]  }
  0x48   :  { %1478 = vmatprep.subr.bf16.mxu0 %v5141_v11  ;;  %1642 = vmatprep.subr.bf16.mxu1 %v5144_v12  ;;  %v6341_v11 = vld [vmem:[%s7712_s0 + $0x10] sm:$0xff]  ;;  %v5236_v12 = vld [vmem:[%s7711_s1 + $0x42c] ss:$16 sps:$4 sm:$0xff]  }
  0x4b   :  { %1479 = vmatpush1.bf16.msra.mxu0 %v5139_v13  ;;  %1643 = vmatpush1.bf16.msra.mxu1 %v5142_v14  ;;  %v4386_v13 = vcombine.high %v6341_v11, %v6341_v11  ;;  %v5231_v14 = vld [vmem:[%s7711_s1 + $0x420] ss:$16 sps:$4 sm:$0xff]  }
  0x4c   :  { %1480 = vmatprep.subr.bf16.mxu0 %v5147_v15  ;;  %1644 = vmatprep.subr.bf16.mxu1 %v5150_v16  ;;  %v5234_v15 = vld [vmem:[%s7711_s1 + $0x428] ss:$16 sps:$4 sm:$0xff]   ;;  %v5239_v16 = vld [vmem:[%s7711_s1 + $0x444] ss:$16 sps:$4 sm:$0xff]  }
  0x4f   :  { %1481 = vmatpush1.bf16.msra.mxu0 %v5145_v17  ;;  %1645 = vmatpush1.bf16.msra.mxu1 %v5148_v18  ;;  %v5242_v17 = vld [vmem:[%s7711_s1 + $0x44c] ss:$16 sps:$4 sm:$0xff]   ;;  %v5237_v18 = vld [vmem:[%s7711_s1 + $0x440] ss:$16 sps:$4 sm:$0xff]  }
  0x50   :  { %1482 = vmatprep.subr.bf16.mxu0 %v5153_v19  ;;  %1646 = vmatprep.subr.bf16.mxu1 %v5156_v20  ;;  %v5240_v19 = vld [vmem:[%s7711_s1 + $0x448] ss:$16 sps:$4 sm:$0xff]   ;;  %v5245_v20 = vld [vmem:[%s7711_s1 + $0x464] ss:$16 sps:$4 sm:$0xff]  }
  0x53   :  { %1483 = vmatpush1.bf16.msra.mxu0 %v5151_v21  ;;  %1647 = vmatpush1.bf16.msra.mxu1 %v5154_v22  ;;  %v5248_v21 = vld [vmem:[%s7711_s1 + $0x46c] ss:$16 sps:$4 sm:$0xff]   ;;  %v5243_v22 = vld [vmem:[%s7711_s1 + $0x460] ss:$16 sps:$4 sm:$0xff]  }
  0x54   :  { %1484 = vmatprep.subr.bf16.mxu0 %v5159_v23  ;;  %1648 = vmatprep.subr.bf16.mxu1 %v5162_v24  ;;  %v5246_v23 = vld [vmem:[%s7711_s1 + $0x468] ss:$16 sps:$4 sm:$0xff]   ;;  %v5251_v24 = vld [vmem:[%s7711_s1 + $0x484] ss:$16 sps:$4 sm:$0xff]  }
  0x57   :  { %1485 = vmatpush1.bf16.msra.mxu0 %v5157_v25  ;;  %1649 = vmatpush1.bf16.msra.mxu1 %v5160_v26  ;;  %v5254_v25 = vld [vmem:[%s7711_s1 + $0x48c] ss:$16 sps:$4 sm:$0xff]   ;;  %v5249_v26 = vld [vmem:[%s7711_s1 + $0x480] ss:$16 sps:$4 sm:$0xff]  }
  0x58   :  { %1486 = vmatprep.subr.bf16.mxu0 %v5165_v27  ;;  %1650 = vmatprep.subr.bf16.mxu1 %v5168_v28  ;;  %v5252_v27 = vld [vmem:[%s7711_s1 + $0x488] ss:$16 sps:$4 sm:$0xff]   ;;  %v5257_v28 = vld [vmem:[%s7711_s1 + $0x4a4] ss:$16 sps:$4 sm:$0xff]  }
  0x5b   :  { %1487 = vmatpush1.bf16.msra.mxu0 %v5163_v31  ;;  %1651 = vmatpush1.bf16.msra.mxu1 %v5166_v32  ;;  %v5258_v31 = vld [vmem:[%s7711_s1 + $0x4a8] ss:$16 sps:$4 sm:$0xff]   ;;  %v5263_v32 = vld [vmem:[%s7711_s1 + $0x4c4] ss:$16 sps:$4 sm:$0xff]  }
  0x5c   :  { %1488 = vmatprep.subr.bf16.mxu0 %v5171_v33  ;;  %1652 = vmatprep.subr.bf16.mxu1 %v5174_v34  ;;  %v5266_v33 = vld [vmem:[%s7711_s1 + $0x4cc] ss:$16 sps:$4 sm:$0xff]   ;;  %v5261_v34 = vld [vmem:[%s7711_s1 + $0x4c0] ss:$16 sps:$4 sm:$0xff]  }
  0x5f   :  { %1489 = vmatpush1.bf16.msra.mxu0 %v5169_v35  ;;  %1653 = vmatpush1.bf16.msra.mxu1 %v5172_v36  ;;  %v5264_v35 = vld [vmem:[%s7711_s1 + $0x4c8] ss:$16 sps:$4 sm:$0xff]   ;;  %v5269_v36 = vld [vmem:[%s7711_s1 + $0x4e4] ss:$16 sps:$4 sm:$0xff]  }
  0x60   :  { %1490 = vmatprep.subr.bf16.mxu0 %v5177_v37  ;;  %1654 = vmatprep.subr.bf16.mxu1 %v5180_v38  ;;  %v5272_v37 = vld [vmem:[%s7711_s1 + $0x4ec] ss:$16 sps:$4 sm:$0xff]   ;;  %v5267_v38 = vld [vmem:[%s7711_s1 + $0x4e0] ss:$16 sps:$4 sm:$0xff]  }
  0x63   :  { %1491 = vmatpush1.bf16.msra.mxu0 %v5175_v39  ;;  %1655 = vmatpush1.bf16.msra.mxu1 %v5178_v40  ;;  %v5270_v39 = vld [vmem:[%s7711_s1 + $0x4e8] ss:$16 sps:$4 sm:$0xff]   ;;  %v5275_v40 = vld [vmem:[%s7711_s1 + $0x504] ss:$16 sps:$4 sm:$0xff]  }
  0x64   :  { %1492 = vmatprep.subr.bf16.mxu0 %v5183_v41  ;;  %1656 = vmatprep.subr.bf16.mxu1 %v5186_v42  ;;  %v5278_v41 = vld [vmem:[%s7711_s1 + $0x50c] ss:$16 sps:$4 sm:$0xff]   ;;  %v5273_v42 = vld [vmem:[%s7711_s1 + $0x500] ss:$16 sps:$4 sm:$0xff]  }
  0x67   :  { %1493 = vmatpush1.bf16.msra.mxu0 %v5181_v43  ;;  %1657 = vmatpush1.bf16.msra.mxu1 %v5184_v44  ;;  %v5276_v43 = vld [vmem:[%s7711_s1 + $0x508] ss:$16 sps:$4 sm:$0xff]   ;;  %v5281_v44 = vld [vmem:[%s7711_s1 + $0x524] ss:$16 sps:$4 sm:$0xff]  }
  0x68   :  { %1494 = vmatprep.subr.bf16.mxu0 %v5189_v45  ;;  %1658 = vmatprep.subr.bf16.mxu1 %v5192_v46  ;;  %v5284_v45 = vld [vmem:[%s7711_s1 + $0x52c] ss:$16 sps:$4 sm:$0xff]   ;;  %v5279_v46 = vld [vmem:[%s7711_s1 + $0x520] ss:$16 sps:$4 sm:$0xff]  }
  0x6b   :  { %1495 = vmatpush1.bf16.msra.mxu0 %v5187_v47  ;;  %1659 = vmatpush1.bf16.msra.mxu1 %v5190_v48  ;;  %v5282_v47 = vld [vmem:[%s7711_s1 + $0x528] ss:$16 sps:$4 sm:$0xff]   ;;  %v5287_v48 = vld [vmem:[%s7711_s1 + $0x544] ss:$16 sps:$4 sm:$0xff]  }
  0x6c   :  { %1496 = vmatprep.subr.bf16.mxu0 %v5195_v49  ;;  %1660 = vmatprep.subr.bf16.mxu1 %v5198_v50  ;;  %v5290_v49 = vld [vmem:[%s7711_s1 + $0x54c] ss:$16 sps:$4 sm:$0xff]   ;;  %v5285_v50 = vld [vmem:[%s7711_s1 + $0x540] ss:$16 sps:$4 sm:$0xff]  }
  0x6f   :  { %1497 = vmatpush1.bf16.msra.mxu0 %v5193_v51  ;;  %1661 = vmatpush1.bf16.msra.mxu1 %v5196_v52  ;;  %v5288_v51 = vld [vmem:[%s7711_s1 + $0x548] ss:$16 sps:$4 sm:$0xff]   ;;  %v5293_v52 = vld [vmem:[%s7711_s1 + $0x564] ss:$16 sps:$4 sm:$0xff]  }
  0x70   :  { %1498 = vmatprep.subr.bf16.mxu0 %v5201_v53  ;;  %1662 = vmatprep.subr.bf16.mxu1 %v5204_v54  ;;  %v5296_v53 = vld [vmem:[%s7711_s1 + $0x56c] ss:$16 sps:$4 sm:$0xff]   ;;  %v5291_v54 = vld [vmem:[%s7711_s1 + $0x560] ss:$16 sps:$4 sm:$0xff]  }
  0x73   :  { %1499 = vmatpush1.bf16.msra.mxu0 %v5199_v55  ;;  %1663 = vmatpush1.bf16.msra.mxu1 %v5202_v56  ;;  %v5294_v55 = vld [vmem:[%s7711_s1 + $0x568] ss:$16 sps:$4 sm:$0xff]   ;;  %v5299_v56 = vld [vmem:[%s7711_s1 + $0x584] ss:$16 sps:$4 sm:$0xff]  }
  0x74   :  { %1500 = vmatprep.subr.bf16.mxu0 %v5207_v57  ;;  %1664 = vmatprep.subr.bf16.mxu1 %v5210_v58  ;;  %v5302_v57 = vld [vmem:[%s7711_s1 + $0x58c] ss:$16 sps:$4 sm:$0xff]   ;;  %v5297_v58 = vld [vmem:[%s7711_s1 + $0x580] ss:$16 sps:$4 sm:$0xff]  }
  0x77   :  { %1501 = vmatpush1.bf16.msra.mxu0 %v5205_v59  ;;  %1665 = vmatpush1.bf16.msra.mxu1 %v5208_v60  ;;  %v5300_v59 = vld [vmem:[%s7711_s1 + $0x588] ss:$16 sps:$4 sm:$0xff]   ;;  %v5305_v60 = vld [vmem:[%s7711_s1 + $0x5a4] ss:$16 sps:$4 sm:$0xff]  }
  0x78   :  { %1502 = vmatprep.subr.bf16.mxu0 %v5213_v61  ;;  %1666 = vmatprep.subr.bf16.mxu1 %v5216_v62  ;;  %v5308_v61 = vld [vmem:[%s7711_s1 + $0x5ac] ss:$16 sps:$4 sm:$0xff]   ;;  %v5303_v62 = vld [vmem:[%s7711_s1 + $0x5a0] ss:$16 sps:$4 sm:$0xff]  }
  0x7b   :  { %1503 = vmatpush1.bf16.msra.mxu0 %v5211_v63  ;;  %1667 = vmatpush1.bf16.msra.mxu1 %v5214_v0  ;;  %v5306_v63 = vld [vmem:[%s7711_s1 + $0x5a8] ss:$16 sps:$4 sm:$0xff]   ;;  %v5311_v0 = vld [vmem:[%s7711_s1 + $0x5c4] ss:$16 sps:$4 sm:$0xff]  }
  0x7c   :  { %1504 = vmatprep.subr.bf16.mxu0 %v5219_v1  ;;  %1668 = vmatprep.subr.bf16.mxu1 %v5222_v2  ;;  %v5314_v1 = vld [vmem:[%s7711_s1 + $0x5cc] ss:$16 sps:$4 sm:$0xff]   ;;  %v5309_v2 = vld [vmem:[%s7711_s1 + $0x5c0] ss:$16 sps:$4 sm:$0xff]  }
  0x7f   :  { %1505 = vmatpush1.bf16.msra.mxu0 %v5217_v3  ;;  %1669 = vmatpush1.bf16.msra.mxu1 %v5220_v4  ;;  %v5312_v3 = vld [vmem:[%s7711_s1 + $0x5c8] ss:$16 sps:$4 sm:$0xff]   ;;  %v5317_v4 = vld [vmem:[%s7711_s1 + $0x5e4] ss:$16 sps:$4 sm:$0xff]  }
  0x80   :  { %1515 = vmatprep.subr.bf16.mxu0 %v5227_v5  ;;  %1679 = vmatprep.subr.bf16.mxu1 %v5230_v6  ;;  %v5320_v5 = vld [vmem:[%s7711_s1 + $0x5ec] ss:$16 sps:$4 sm:$0xff]   ;;  %v5315_v6 = vld [vmem:[%s7711_s1 + $0x5e0] ss:$16 sps:$4 sm:$0xff]  }
  0x82   :  { %1507 = vmatmul.mubr.bf16.vlgmr.msra.gmra.mrb[0].mxu0 %v4383_v7  ;;  %1671 = vmatmul.mubr.bf16.vlgmr.msra.gmra.mrb[0].mxu1 %v4383_v7  ;;  %v5318_v7 = vld [vmem:[%s7711_s1 + $0x5e8] ss:$16 sps:$4 sm:$0xff]  }
  0x83   :  { %1516 = vmatpush1.bf16.msra.mxu0 %v5225_v8  ;;  %1680 = vmatpush1.bf16.msra.mxu1 %v5228_v9  ;;  %v5325_v8 = vld [vmem:[%s7711_s1 + $0x604] ss:$16 sps:$4 sm:$0xff]   ;;  %v5328_v9 = vld [vmem:[%s7711_s1 + $0x60c] ss:$16 sps:$4 sm:$0xff]  }
  0x84   :  { %1517 = vmatprep.subr.bf16.mxu0 %v5233_v10  ;;  %1681 = vmatprep.subr.bf16.mxu1 %v5236_v12  ;;  %v4385_v10 = vcombine.low %v6341_v11, %v6341_v11  ;;  %v5323_v12 = vld [vmem:[%s7711_s1 + $0x600] ss:$16 sps:$4 sm:$0xff]   ;;  %v5334_v11 = vld [vmem:[%s7711_s1 + $0x62c] ss:$16 sps:$4 sm:$0xff]  }
  0x85   :  { %1547 = vmatprep.mubr.bf16.mxu0 %v4386_v13  ;;  %1711 = vmatprep.mubr.bf16.mxu1 %v4386_v13  ;;  %v5326_v13 = vld [vmem:[%s7711_s1 + $0x608] ss:$16 sps:$4 sm:$0xff]  }
  0x87   :  { %1518 = vmatpush1.bf16.msra.mxu0 %v5231_v14  ;;  %1682 = vmatpush1.bf16.msra.mxu1 %v5234_v15  ;;  %v5331_v14 = vld [vmem:[%s7711_s1 + $0x624] ss:$16 sps:$4 sm:$0xff]   ;;  %v5329_v15 = vld [vmem:[%s7711_s1 + $0x620] ss:$16 sps:$4 sm:$0xff]  }
  0x88   :  { %1519 = vmatprep.subr.bf16.mxu0 %v5239_v16  ;;  %1683 = vmatprep.subr.bf16.mxu1 %v5242_v17  ;;  %v5332_v16 = vld [vmem:[%s7711_s1 + $0x628] ss:$16 sps:$4 sm:$0xff]   ;;  %v5337_v17 = vld [vmem:[%s7711_s1 + $0x644] ss:$16 sps:$4 sm:$0xff]  }
  0x8b   :  { %1520 = vmatpush1.bf16.msra.mxu0 %v5237_v18  ;;  %1684 = vmatpush1.bf16.msra.mxu1 %v5240_v19  ;;  %v5340_v18 = vld [vmem:[%s7711_s1 + $0x64c] ss:$16 sps:$4 sm:$0xff]   ;;  %v5866_v19 = vmov 0  }
  0x8c   :  { %1521 = vmatprep.subr.bf16.mxu0 %v5245_v20  ;;  %1685 = vmatprep.subr.bf16.mxu1 %v5248_v21  ;;  %v5335_v20 = vld [vmem:[%s7711_s1 + $0x640] ss:$16 sps:$4 sm:$0xff]   ;;  %v5338_v21 = vld [vmem:[%s7711_s1 + $0x648] ss:$16 sps:$4 sm:$0xff]  }
  0x8f   :  { %1522 = vmatpush1.bf16.msra.mxu0 %v5243_v22  ;;  %1686 = vmatpush1.bf16.msra.mxu1 %v5246_v23  ;;  %v5343_v22 = vld [vmem:[%s7711_s1 + $0x664] ss:$16 sps:$4 sm:$0xff]   ;;  %v5346_v23 = vld [vmem:[%s7711_s1 + $0x66c] ss:$16 sps:$4 sm:$0xff]  }
  0x90   :  { %1523 = vmatprep.subr.bf16.mxu0 %v5251_v24  ;;  %1687 = vmatprep.subr.bf16.mxu1 %v5254_v25  ;;  %v5341_v24 = vld [vmem:[%s7711_s1 + $0x660] ss:$16 sps:$4 sm:$0xff]   ;;  %v5344_v25 = vld [vmem:[%s7711_s1 + $0x668] ss:$16 sps:$4 sm:$0xff]  }
  0x93   :  { %1524 = vmatpush1.bf16.msra.mxu0 %v5249_v26  ;;  %1688 = vmatpush1.bf16.msra.mxu1 %v5252_v27  ;;  %v5349_v26 = vld [vmem:[%s7711_s1 + $0x684] ss:$16 sps:$4 sm:$0xff]   ;;  %v5352_v27 = vld [vmem:[%s7711_s1 + $0x68c] ss:$16 sps:$4 sm:$0xff]  }
  0x94   :  { %1525 = vmatprep.subr.bf16.mxu0 %v5257_v28  ;;  %1689 = vmatprep.subr.bf16.mxu1 %v5260_v29  ;;  %v5347_v28 = vld [vmem:[%s7711_s1 + $0x680] ss:$16 sps:$4 sm:$0xff]   ;;  %v5350_v29 = vld [vmem:[%s7711_s1 + $0x688] ss:$16 sps:$4 sm:$0xff]  }
  0x97   :  { %1526 = vmatpush1.bf16.msra.mxu0 %v5255_v30  ;;  %1690 = vmatpush1.bf16.msra.mxu1 %v5258_v31  ;;  %v5355_v30 = vld [vmem:[%s7711_s1 + $0x6a4] ss:$16 sps:$4 sm:$0xff]   ;;  %v5358_v31 = vld [vmem:[%s7711_s1 + $0x6ac] ss:$16 sps:$4 sm:$0xff]  }
  0x98   :  { %1527 = vmatprep.subr.bf16.mxu0 %v5263_v32  ;;  %1691 = vmatprep.subr.bf16.mxu1 %v5266_v33  ;;  %v5353_v32 = vld [vmem:[%s7711_s1 + $0x6a0] ss:$16 sps:$4 sm:$0xff]   ;;  %v5356_v33 = vld [vmem:[%s7711_s1 + $0x6a8] ss:$16 sps:$4 sm:$0xff]  }
  0x9b   :  { %1528 = vmatpush1.bf16.msra.mxu0 %v5261_v34  ;;  %1692 = vmatpush1.bf16.msra.mxu1 %v5264_v35  ;;  %v5361_v34 = vld [vmem:[%s7711_s1 + $0x6c4] ss:$16 sps:$4 sm:$0xff]   ;;  %v5364_v35 = vld [vmem:[%s7711_s1 + $0x6cc] ss:$16 sps:$4 sm:$0xff]  }
  0x9c   :  { %1529 = vmatprep.subr.bf16.mxu0 %v5269_v36  ;;  %1693 = vmatprep.subr.bf16.mxu1 %v5272_v37  ;;  %v5359_v36 = vld [vmem:[%s7711_s1 + $0x6c0] ss:$16 sps:$4 sm:$0xff]   ;;  %v5362_v37 = vld [vmem:[%s7711_s1 + $0x6c8] ss:$16 sps:$4 sm:$0xff]  }
  0x9f   :  { %1530 = vmatpush1.bf16.msra.mxu0 %v5267_v38  ;;  %1694 = vmatpush1.bf16.msra.mxu1 %v5270_v39  ;;  %v5367_v38 = vld [vmem:[%s7711_s1 + $0x6e4] ss:$16 sps:$4 sm:$0xff]   ;;  %v5370_v39 = vld [vmem:[%s7711_s1 + $0x6ec] ss:$16 sps:$4 sm:$0xff]  }
  0xa0   :  { %1531 = vmatprep.subr.bf16.mxu0 %v5275_v40  ;;  %1695 = vmatprep.subr.bf16.mxu1 %v5278_v41  ;;  %v5365_v40 = vld [vmem:[%s7711_s1 + $0x6e0] ss:$16 sps:$4 sm:$0xff]   ;;  %v5368_v41 = vld [vmem:[%s7711_s1 + $0x6e8] ss:$16 sps:$4 sm:$0xff]  }
  0xa3   :  { %1532 = vmatpush1.bf16.msra.mxu0 %v5273_v42  ;;  %1696 = vmatpush1.bf16.msra.mxu1 %v5276_v43  ;;  %v5374_v42 = vld [vmem:[%s7713_s3 + $0x4] ss:$8 sps:$4 sm:$0xff]   ;;  %v5371_v43 = vld [vmem:[%s7712_s0 + $0x18] ss:$0 sps:$4 sm:$0xff]  }
  0xa4   :  { %1533 = vmatprep.subr.bf16.mxu0 %v5281_v44  ;;  %1697 = vmatprep.subr.bf16.mxu1 %v5284_v45  ;;  %v5372_v44 = vld [vmem:[%s7713_s3] ss:$8 sps:$4 sm:$0xff]   ;;  %v5377_v45 = vld [vmem:[%s7713_s3 + $0x14] ss:$8 sps:$4 sm:$0xff]  }
  0xa7   :  { %1534 = vmatpush1.bf16.msra.mxu0 %v5279_v46  ;;  %1698 = vmatpush1.bf16.msra.mxu1 %v5282_v47  ;;  %v5375_v46 = vld [vmem:[%s7713_s3 + $0x10] ss:$8 sps:$4 sm:$0xff]   ;;  %v5380_v47 = vld [vmem:[%s7713_s3 + $0x24] ss:$8 sps:$4 sm:$0xff]  }
  0xa8   :  { %1535 = vmatprep.subr.bf16.mxu0 %v5287_v48  ;;  %1699 = vmatprep.subr.bf16.mxu1 %v5290_v49  ;;  %v5378_v48 = vld [vmem:[%s7713_s3 + $0x20] ss:$8 sps:$4 sm:$0xff]   ;;  %v5383_v49 = vld [vmem:[%s7713_s3 + $0x34] ss:$8 sps:$4 sm:$0xff]  }
  0xab   :  { %1536 = vmatpush1.bf16.msra.mxu0 %v5285_v50  ;;  %1700 = vmatpush1.bf16.msra.mxu1 %v5288_v51  ;;  %v5381_v50 = vld [vmem:[%s7713_s3 + $0x30] ss:$8 sps:$4 sm:$0xff]   ;;  %v5386_v51 = vld [vmem:[%s7713_s3 + $0x44] ss:$8 sps:$4 sm:$0xff]  }
  0xac   :  { %1537 = vmatprep.subr.bf16.mxu0 %v5293_v52  ;;  %1701 = vmatprep.subr.bf16.mxu1 %v5296_v53  ;;  %v5384_v52 = vld [vmem:[%s7713_s3 + $0x40] ss:$8 sps:$4 sm:$0xff]   ;;  %v5389_v53 = vld [vmem:[%s7713_s3 + $0x54] ss:$8 sps:$4 sm:$0xff]  }
  0xaf   :  { %1538 = vmatpush1.bf16.msra.mxu0 %v5291_v54  ;;  %1702 = vmatpush1.bf16.msra.mxu1 %v5294_v55  ;;  %v5387_v54 = vld [vmem:[%s7713_s3 + $0x50] ss:$8 sps:$4 sm:$0xff]   ;;  %v5392_v55 = vld [vmem:[%s7713_s3 + $0x64] ss:$8 sps:$4 sm:$0xff]  }
  0xb0   :  { %1539 = vmatprep.subr.bf16.mxu0 %v5299_v56  ;;  %1703 = vmatprep.subr.bf16.mxu1 %v5302_v57  ;;  %v5390_v56 = vld [vmem:[%s7713_s3 + $0x60] ss:$8 sps:$4 sm:$0xff]   ;;  %v5395_v57 = vld [vmem:[%s7713_s3 + $0x74] ss:$8 sps:$4 sm:$0xff]  }
  0xb3   :  { %1540 = vmatpush1.bf16.msra.mxu0 %v5297_v58  ;;  %1704 = vmatpush1.bf16.msra.mxu1 %v5300_v59  ;;  %v5393_v58 = vld [vmem:[%s7713_s3 + $0x70] ss:$8 sps:$4 sm:$0xff]   ;;  %v5398_v59 = vld [vmem:[%s7713_s3 + $0x84] ss:$8 sps:$4 sm:$0xff]  }
  0xb4   :  { %1541 = vmatprep.subr.bf16.mxu0 %v5305_v60  ;;  %1705 = vmatprep.subr.bf16.mxu1 %v5308_v61  ;;  %v5396_v60 = vld [vmem:[%s7713_s3 + $0x80] ss:$8 sps:$4 sm:$0xff]   ;;  %v5401_v61 = vld [vmem:[%s7713_s3 + $0x94] ss:$8 sps:$4 sm:$0xff]  }
  0xb7   :  { %1542 = vmatpush1.bf16.msra.mxu0 %v5303_v62  ;;  %1706 = vmatpush1.bf16.msra.mxu1 %v5306_v63  ;;  %v5399_v62 = vld [vmem:[%s7713_s3 + $0x90] ss:$8 sps:$4 sm:$0xff]   ;;  %v5404_v63 = vld [vmem:[%s7713_s3 + $0xa4] ss:$8 sps:$4 sm:$0xff]  }
  0xb8   :  { %1543 = vmatprep.subr.bf16.mxu0 %v5311_v0  ;;  %1707 = vmatprep.subr.bf16.mxu1 %v5314_v1  ;;  %v5402_v0 = vld [vmem:[%s7713_s3 + $0xa0] ss:$8 sps:$4 sm:$0xff]   ;;  %v5407_v1 = vld [vmem:[%s7713_s3 + $0xb4] ss:$8 sps:$4 sm:$0xff]  }
  0xbb   :  { %1544 = vmatpush1.bf16.msra.mxu0 %v5309_v2  ;;  %1708 = vmatpush1.bf16.msra.mxu1 %v5312_v3  ;;  %v5405_v2 = vld [vmem:[%s7713_s3 + $0xb0] ss:$8 sps:$4 sm:$0xff]   ;;  %v5410_v3 = vld [vmem:[%s7713_s3 + $0xc4] ss:$8 sps:$4 sm:$0xff]  }
  0xbc   :  { %1545 = vmatprep.subr.bf16.mxu0 %v5317_v4  ;;  %1709 = vmatprep.subr.bf16.mxu1 %v5320_v5  ;;  %v5408_v4 = vld [vmem:[%s7713_s3 + $0xc0] ss:$8 sps:$4 sm:$0xff]   ;;  %v5413_v5 = vld [vmem:[%s7713_s3 + $0xd4] ss:$8 sps:$4 sm:$0xff]  }
  0xbf   :  { %1546 = vmatpush1.bf16.msra.mxu0 %v5315_v6  ;;  %1710 = vmatpush1.bf16.msra.mxu1 %v5318_v7  ;;  %v5411_v6 = vld [vmem:[%s7713_s3 + $0xd0] ss:$8 sps:$4 sm:$0xff]   ;;  %v5416_v7 = vld [vmem:[%s7713_s3 + $0xe4] ss:$8 sps:$4 sm:$0xff]  }
  0xc0   :  { %1556 = vmatprep.subr.bf16.mxu0 %v5325_v8  ;;  %1720 = vmatprep.subr.bf16.mxu1 %v5328_v9  ;;  %v5414_v8 = vld [vmem:[%s7713_s3 + $0xe0] ss:$8 sps:$4 sm:$0xff]   ;;  %v5419_v9 = vld [vmem:[%s7713_s3 + $0xf4] ss:$8 sps:$4 sm:$0xff]  }
  0xc2   :  { %1548 = vmatmul.mubr.bf16.vlgmr.msra.gmra.mrb[0].mxu0 %v4385_v10  ;;  %1712 = vmatmul.mubr.bf16.vlgmr.msra.gmra.mrb[0].mxu1 %v4385_v10  ;;  %v5417_v10 = vld [vmem:[%s7713_s3 + $0xf0] ss:$8 sps:$4 sm:$0xff]  }
  0xc3   :  { %1557 = vmatpush1.bf16.msra.mxu0 %v5323_v12  ;;  %1721 = vmatpush1.bf16.msra.mxu1 %v5326_v13  ;;  %v5422_v12 = vld [vmem:[%s7713_s3 + $0x104] ss:$8 sps:$4 sm:$0xff]   ;;  %v5468_v13 = vld [vmem:[%s7714_s5] ss:$16 sps:$4 sm:$0xff]  }
  0xc4   :  { %1558 = vmatprep.subr.bf16.mxu0 %v5331_v14  ;;  %1722 = vmatprep.subr.bf16.mxu1 %v5334_v11  ;;  %v5470_v14 = vld [vmem:[%s7714_s5 + $0x4] ss:$16 sps:$4 sm:$0xff]   ;;  %v5471_v11 = vld [vmem:[%s7714_s5 + $0x20] ss:$16 sps:$4 sm:$0xff]  }
  0xc5   :  { %1588 = vmatprep.mubr.bf16.mxu0 %v5866_v19  ;;  %1752 = vmatprep.mubr.bf16.mxu1 %v5866_v19 }
  0xc7   :  { %1559 = vmatpush1.bf16.msra.mxu0 %v5329_v15  ;;  %1723 = vmatpush1.bf16.msra.mxu1 %v5332_v16  ;;  %v5473_v15 = vld [vmem:[%s7714_s5 + $0x24] ss:$16 sps:$4 sm:$0xff]   ;;  %v268_v16 = vlaneseq }
  0xc8   :  { %1560 = vmatprep.subr.bf16.mxu0 %v5337_v17  ;;  %1724 = vmatprep.subr.bf16.mxu1 %v5340_v18 }
  0xc9   :  { %v6737_v17 = vshrl.u32 %v268_v16, 7  ;;  %v5474_v16 = vld [vmem:[%s7714_s5 + $0x40] ss:$16 sps:$4 sm:$0xff]  }
  0xcb   :  { %1561 = vmatpush1.bf16.msra.mxu0 %v5335_v20  ;;  %1725 = vmatpush1.bf16.msra.mxu1 %v5338_v21  ;;  %v6740_v18 = vsub.s32 0, %v6737_v17  ;;  %v6745_v20 = vld [vmem:[%s7715_s2] sm:$0xf]  ;;  %v6748_v21 = vsub.s32 1, %v6737_v17 }
  0xcc   :  { %1562 = vmatprep.subr.bf16.mxu0 %v5343_v22  ;;  %1726 = vmatprep.subr.bf16.mxu1 %v5346_v23  ;;  %v6751_v22 = vsub.s32 3, %v6737_v17 }
  0xcd   :  { %v271_v23 = vrot.slane %v6745_v20, %v6740_v18 }
  0xcf   :  { %1563 = vmatpush1.bf16.msra.mxu0 %v5341_v24  ;;  %1727 = vmatpush1.bf16.msra.mxu1 %v5344_v25  ;;  %v275_v24 = vrot.slane %v6745_v20, %v6748_v21  ;;  %v283_v25 = vrot.slane %v6745_v20, %v6751_v22 }
  0xd0   :  { %1564 = vmatprep.subr.bf16.mxu0 %v5349_v26  ;;  %1728 = vmatprep.subr.bf16.mxu1 %v5352_v27 }
  0xd3   :  { %1565 = vmatpush1.bf16.msra.mxu0 %v5347_v28  ;;  %1729 = vmatpush1.bf16.msra.mxu1 %v5350_v29 }
  0xd4   :  { %1566 = vmatprep.subr.bf16.mxu0 %v5355_v30  ;;  %1730 = vmatprep.subr.bf16.mxu1 %v5358_v31 }
  0xd7   :  { %1567 = vmatpush1.bf16.msra.mxu0 %v5353_v32  ;;  %1731 = vmatpush1.bf16.msra.mxu1 %v5356_v33 }
  0xd8   :  { %1568 = vmatprep.subr.bf16.mxu0 %v5361_v34  ;;  %1732 = vmatprep.subr.bf16.mxu1 %v5364_v35 }
  0xdb   :  { %1569 = vmatpush1.bf16.msra.mxu0 %v5359_v36  ;;  %1733 = vmatpush1.bf16.msra.mxu1 %v5362_v37 }
  0xdc   :  { %1570 = vmatprep.subr.bf16.mxu0 %v5367_v38  ;;  %1734 = vmatprep.subr.bf16.mxu1 %v5370_v39 }
  0xdf   :  { %1571 = vmatpush1.bf16.msra.mxu0 %v5365_v40  ;;  %1735 = vmatpush1.bf16.msra.mxu1 %v5368_v41  ;;  %v5420_v41 = vld [vmem:[%s7713_s3 + $0x100] ss:$8 sps:$4 sm:$0xff]  }
  0xe0   :  { %2165 = vmatprep.subr.bf16.mxu0 %v5374_v42  ;;  %2470 = vmatprep.subr.bf16.mxu1 %v5470_v14 }
  0xe2   :  { %1589 = vmatmul.mubr.bf16.vlgmr.msra.gmra.mrb[0].mxu0 %v5371_v43  ;;  %1753 = vmatmul.mubr.bf16.vlgmr.msra.gmra.mrb[0].mxu1 %v5371_v43  ;;  %v5425_v43 = vld [vmem:[%s7713_s3 + $0x114] ss:$8 sps:$4 sm:$0xff]  }
  0xe3   :  { %2166 = vmatpush1.bf16.msra.mxu0 %v5372_v44  ;;  %2502 = vmatprep.mubr.bf16.mxu1 %v5866_v19 }
  0xe4   :  { %2167 = vmatprep.subr.bf16.mxu0 %v5377_v45  ;;  %2471 = vmatpush1.bf16.msra.mxu1 %v5468_v13  ;;  %v5423_v45 = vld [vmem:[%s7713_s3 + $0x110] ss:$8 sps:$4 sm:$0xff]  }
  0xe5   :  { %2472 = vmatprep.subr.bf16.mxu1 %v5473_v15  ;;  %v5465_v13 = vld [vmem:[%s7713_s3 + $0x1f0] ss:$8 sps:$4 sm:$0xff]   ;;  %v5476_v15 = vld [vmem:[%s7714_s5 + $0x44] ss:$16 sps:$4 sm:$0xff]  }
  0xe7   :  { %2168 = vmatpush1.bf16.msra.mxu0 %v5375_v46  ;;  %v5428_v46 = vld [vmem:[%s7713_s3 + $0x124] ss:$8 sps:$4 sm:$0xff]  }
  0xe8   :  { %2169 = vmatprep.subr.bf16.mxu0 %v5380_v47  ;;  %2473 = vmatpush1.bf16.msra.mxu1 %v5471_v11  ;;  %v5426_v47 = vld [vmem:[%s7713_s3 + $0x120] ss:$8 sps:$4 sm:$0xff]  }
  0xe9   :  { %2474 = vmatprep.subr.bf16.mxu1 %v5476_v15 }
  0xeb   :  { %2170 = vmatpush1.bf16.msra.mxu0 %v5378_v48  ;;  %v5431_v48 = vld [vmem:[%s7713_s3 + $0x134] ss:$8 sps:$4 sm:$0xff]  }
  0xec   :  { %2171 = vmatprep.subr.bf16.mxu0 %v5383_v49  ;;  %v5429_v49 = vld [vmem:[%s7713_s3 + $0x130] ss:$8 sps:$4 sm:$0xff]   ;;  %2475 = vmatpush1.bf16.msra.mxu1 %v5474_v16 }
  0xed   :  { %v5495_v16 = vld [vmem:[%s7714_s5 + $0x28] ss:$16 sps:$4 sm:$0xff]  }
  0xef   :  { %2172 = vmatpush1.bf16.msra.mxu0 %v5381_v50  ;;  %v5434_v50 = vld [vmem:[%s7713_s3 + $0x144] ss:$8 sps:$4 sm:$0xff]  }
  0xf0   :  { %2173 = vmatprep.subr.bf16.mxu0 %v5386_v51  ;;  %v5432_v51 = vld [vmem:[%s7713_s3 + $0x140] ss:$8 sps:$4 sm:$0xff]  }
  0xf3   :  { %2174 = vmatpush1.bf16.msra.mxu0 %v5384_v52  ;;  %v5437_v52 = vld [vmem:[%s7713_s3 + $0x154] ss:$8 sps:$4 sm:$0xff]  }
  0xf4   :  { %2175 = vmatprep.subr.bf16.mxu0 %v5389_v53  ;;  %v5435_v53 = vld [vmem:[%s7713_s3 + $0x150] ss:$8 sps:$4 sm:$0xff]  }
  0xf7   :  { %2176 = vmatpush1.bf16.msra.mxu0 %v5387_v54  ;;  %v5440_v54 = vld [vmem:[%s7713_s3 + $0x164] ss:$8 sps:$4 sm:$0xff]  }
  0xf8   :  { %2177 = vmatprep.subr.bf16.mxu0 %v5392_v55  ;;  %v5438_v55 = vld [vmem:[%s7713_s3 + $0x160] ss:$8 sps:$4 sm:$0xff]  }
  0xfb   :  { %2178 = vmatpush1.bf16.msra.mxu0 %v5390_v56  ;;  %v5443_v56 = vld [vmem:[%s7713_s3 + $0x174] ss:$8 sps:$4 sm:$0xff]  }
  0xfc   :  { %2179 = vmatprep.subr.bf16.mxu0 %v5395_v57  ;;  %v5441_v57 = vld [vmem:[%s7713_s3 + $0x170] ss:$8 sps:$4 sm:$0xff]  }
  0xff   :  { %2180 = vmatpush1.bf16.msra.mxu0 %v5393_v58  ;;  %v5446_v58 = vld [vmem:[%s7713_s3 + $0x184] ss:$8 sps:$4 sm:$0xff]  }
 0x100   :  { %2181 = vmatprep.subr.bf16.mxu0 %v5398_v59  ;;  %v5444_v59 = vld [vmem:[%s7713_s3 + $0x180] ss:$8 sps:$4 sm:$0xff]  }
 0x103   :  { %2182 = vmatpush1.bf16.msra.mxu0 %v5396_v60  ;;  %v5449_v60 = vld [vmem:[%s7713_s3 + $0x194] ss:$8 sps:$4 sm:$0xff]  }
 0x104   :  { %2183 = vmatprep.subr.bf16.mxu0 %v5401_v61  ;;  %v5447_v61 = vld [vmem:[%s7713_s3 + $0x190] ss:$8 sps:$4 sm:$0xff]  }
 0x107   :  { %2184 = vmatpush1.bf16.msra.mxu0 %v5399_v62  ;;  %v5452_v62 = vld [vmem:[%s7713_s3 + $0x1a4] ss:$8 sps:$4 sm:$0xff]  }
 0x108   :  { %2185 = vmatprep.subr.bf16.mxu0 %v5404_v63  ;;  %v5450_v63 = vld [vmem:[%s7713_s3 + $0x1a0] ss:$8 sps:$4 sm:$0xff]  }
 0x10b   :  { %2186 = vmatpush1.bf16.msra.mxu0 %v5402_v0  ;;  %v5455_v0 = vld [vmem:[%s7713_s3 + $0x1b4] ss:$8 sps:$4 sm:$0xff]  }
 0x10c   :  { %2187 = vmatprep.subr.bf16.mxu0 %v5407_v1  ;;  %v5453_v1 = vld [vmem:[%s7713_s3 + $0x1b0] ss:$8 sps:$4 sm:$0xff]  }
 0x10f   :  { %2188 = vmatpush1.bf16.msra.mxu0 %v5405_v2  ;;  %v5458_v2 = vld [vmem:[%s7713_s3 + $0x1c4] ss:$8 sps:$4 sm:$0xff]  }
 0x110   :  { %2189 = vmatprep.subr.bf16.mxu0 %v5410_v3  ;;  %v5456_v3 = vld [vmem:[%s7713_s3 + $0x1c0] ss:$8 sps:$4 sm:$0xff]  }
 0x113   :  { %2190 = vmatpush1.bf16.msra.mxu0 %v5408_v4  ;;  %v6837_v4 = vsub.s32 2, %v6737_v17 }
 0x114   :  { %2191 = vmatprep.subr.bf16.mxu0 %v5413_v5  ;;  %v5461_v5 = vld [vmem:[%s7713_s3 + $0x1d4] ss:$8 sps:$4 sm:$0xff]  }
 0x117   :  { %2192 = vmatpush1.bf16.msra.mxu0 %v5411_v6  ;;  %v5459_v6 = vld [vmem:[%s7713_s3 + $0x1d0] ss:$8 sps:$4 sm:$0xff]  }
 0x118   :  { %2193 = vmatprep.subr.bf16.mxu0 %v5416_v7  ;;  %v279_v7 = vrot.slane %v6745_v20, %v6837_v4  ;;  %v5479_v20 = vld [vmem:[%s7714_s5 + $0x64] ss:$16 sps:$4 sm:$0xff]  }
 0x119   :  { %2476 = vmatprep.subr.bf16.mxu1 %v5479_v20  ;;  %v5500_v20 = vld [vmem:[%s7714_s5 + $0x4c] ss:$16 sps:$4 sm:$0xff]  }
 0x11b   :  { %2194 = vmatpush1.bf16.msra.mxu0 %v5414_v8  ;;  %v5464_v8 = vld [vmem:[%s7713_s3 + $0x1e4] ss:$8 sps:$4 sm:$0xff]  }
 0x11c   :  { %2195 = vmatprep.subr.bf16.mxu0 %v5419_v9  ;;  %v5462_v9 = vld [vmem:[%s7713_s3 + $0x1e0] ss:$8 sps:$4 sm:$0xff]  }
 0x11f   :  { %2196 = vmatpush1.bf16.msra.mxu0 %v5417_v10 }
 0x120   :  { %2206 = vmatprep.subr.bf16.mxu0 %v5422_v12  ;;  %v5467_v12 = vld [vmem:[%s7713_s3 + $0x1f4] ss:$8 sps:$4 sm:$0xff]  }
 0x1b5   :  { %v1590_v26 = vpop.f32.mrb[0].mxu0  ;;  %v6759_v27 = vpop.f32.mrb[0].mxu1 }
 0x1b6   :  { %v4976_v28 = vadd.f32 %v1590_v26, %v271_v23  ;;  %v1592_v29 = vpop.f32.mrb[1].mxu0  ;;  %v1756_v30 = vpop.f32.mrb[1].mxu1  ;;  %v4978_v10 = vadd.f32 %v6759_v27, %v279_v7  ;;  %v5477_v23 = vld [vmem:[%s7714_s5 + $0x60] ss:$16 sps:$4 sm:$0xff]   ;;  %v5485_v26 = vld [vmem:[%s7714_s5 + $0xa4] ss:$16 sps:$4 sm:$0xff]  }
 0x1b7   :  { %v4977_v31 = vadd.f32 %v1592_v29, %v275_v24  ;;  %v4979_v32 = vadd.f32 %v1756_v30, %v283_v25  ;;  %v1594_v33 = vpop.f32.mrb[2].mxu0  ;;  %v1758_v34 = vpop.f32.mrb[2].mxu1  ;;  %2477 = vmatpush1.bf16.msra.mxu1 %v5477_v23  ;;  %v5482_v24 = vld [vmem:[%s7714_s5 + $0x84] ss:$16 sps:$4 sm:$0xff]   ;;  %v5480_v25 = vld [vmem:[%s7714_s5 + $0x80] ss:$16 sps:$4 sm:$0xff]  }
 0x1b8   :  { %v1761_v35 = vmax.f32 %v4976_v28, 0.0  ;;  %v1595_v36 = vpop.f32.mrb[3].mxu0  ;;  %v1759_v37 = vpop.f32.mrb[3].mxu1  ;;  %v1763_v14 = vmax.f32 %v4978_v10, 0.0  ;;  %2478 = vmatprep.subr.bf16.mxu1 %v5482_v24  ;;  %v5483_v27 = vld [vmem:[%s7714_s5 + $0xa0] ss:$16 sps:$4 sm:$0xff]  }
 0x1b9   :  { %v1762_v38 = vmax.f32 %v4977_v31, 0.0  ;;  %v1764_v39 = vmax.f32 %v4979_v32, 0.0  ;;  %v5488_v28 = vld [vmem:[%s7714_s5 + $0xc4] ss:$16 sps:$4 sm:$0xff]   ;;  %v5486_v29 = vld [vmem:[%s7714_s5 + $0xc0] ss:$16 sps:$4 sm:$0xff]  }
 0x1ba   :  { %v1765_v42 = vpack.c.bf16 %v1761_v35, %v1761_v35  ;;  %v1767_v11 = vpack.c.bf16 %v1763_v14, %v1763_v14  ;;  %v5491_v30 = vld [vmem:[%s7714_s5 + $0xe4] ss:$16 sps:$4 sm:$0xff]   ;;  %v5489_v31 = vld [vmem:[%s7714_s5 + $0xe0] ss:$16 sps:$4 sm:$0xff]   ;;  %v5494_v32 = vld [vmem:[%s7714_s5 + $0xc] ss:$16 sps:$4 sm:$0xff]  }
 0x1bb   :  { %v1766_v40 = vpack.c.bf16 %v1762_v38, %v1762_v38  ;;  %v1768_v44 = vpack.c.bf16 %v1764_v39, %v1764_v39  ;;  %2479 = vmatpush1.bf16.msra.mxu1 %v5480_v25  ;;  %v5519_v33 = vld [vmem:[%s7716_s7 + $0x8] ss:$28 sps:$4 sm:$0xff]   ;;  %v5525_v35 = vld [vmem:[%s7716_s7 + $0x40] ss:$28 sps:$4 sm:$0xff]   ;;  %v5531_v38 = vld [vmem:[%s7716_s7 + $0x78] ss:$28 sps:$4 sm:$0xff]  }
 0x1bc   :  { %2480 = vmatprep.subr.bf16.mxu1 %v5485_v26  ;;  %v5521_v34 = vld [vmem:[%s7716_s7 + $0xc] ss:$28 sps:$4 sm:$0xff]   ;;  %v5527_v36 = vld [vmem:[%s7716_s7 + $0x44] ss:$28 sps:$4 sm:$0xff]   ;;  %v5533_v37 = vld [vmem:[%s7716_s7 + $0x7c] ss:$28 sps:$4 sm:$0xff]  }
 0x1bd   :  { %2197 = vmatprep.mubr.bf16.mxu0 %v1766_v40  ;;  %v5539_v39 = vld [vmem:[%s7716_s7 + $0xb4] ss:$28 sps:$4 sm:$0xff]   ;;  %v5498_v23 = vld [vmem:[%s7714_s5 + $0x48] ss:$16 sps:$4 sm:$0xff]   ;;  %v5503_v24 = vld [vmem:[%s7714_s5 + $0x6c] ss:$16 sps:$4 sm:$0xff]  }
 0x1be   :  { %2198 = vmatmul.mubr.bf16.vlgmr.msra.gmra.mrb[4].mxu0 %v1765_v42  ;;  %v5537_v40 = vld [vmem:[%s7716_s7 + $0xb0] ss:$28 sps:$4 sm:$0xff]   ;;  %v5543_v42 = vld [vmem:[%s7716_s7 + $0xe8] ss:$28 sps:$4 sm:$0xff]  }
 0x1bf   :  { %2207 = vmatpush1.bf16.msra.mxu0 %v5420_v41  ;;  %2238 = vmatprep.mubr.bf16.mxu0 %v1768_v44  ;;  %v5545_v41 = vld [vmem:[%s7716_s7 + $0xec] ss:$28 sps:$4 sm:$0xff]   ;;  %v5549_v44 = vld [vmem:[%s7716_s7 + $0x120] ss:$28 sps:$4 sm:$0xff]  }
 0x1c0   :  { %2208 = vmatprep.subr.bf16.mxu0 %v5425_v43  ;;  %2481 = vmatpush1.bf16.msra.mxu1 %v5483_v27  ;;  %v5551_v43 = vld [vmem:[%s7716_s7 + $0x124] ss:$28 sps:$4 sm:$0xff]   ;;  %v5501_v25 = vld [vmem:[%s7714_s5 + $0x68] ss:$16 sps:$4 sm:$0xff]   ;;  %v5509_v27 = vld [vmem:[%s7714_s5 + $0xac] ss:$16 sps:$4 sm:$0xff]  }
 0x1c1   :  { %2482 = vmatprep.subr.bf16.mxu1 %v5488_v28  ;;  %v5504_v26 = vld [vmem:[%s7714_s5 + $0x88] ss:$16 sps:$4 sm:$0xff]  }
 0x1c2   :  { %v5507_v28 = vld [vmem:[%s7714_s5 + $0xa8] ss:$16 sps:$4 sm:$0xff]  }
 0x1c3   :  { %2209 = vmatpush1.bf16.msra.mxu0 %v5423_v45  ;;  %v5557_v45 = vld [vmem:[%s7716_s7 + $0x15c] ss:$28 sps:$4 sm:$0xff]  }
 0x1c4   :  { %2210 = vmatprep.subr.bf16.mxu0 %v5428_v46  ;;  %2483 = vmatpush1.bf16.msra.mxu1 %v5486_v29  ;;  %v5555_v46 = vld [vmem:[%s7716_s7 + $0x158] ss:$28 sps:$4 sm:$0xff]   ;;  %v5512_v29 = vld [vmem:[%s7714_s5 + $0xcc] ss:$16 sps:$4 sm:$0xff]  }
 0x1c5   :  { %2484 = vmatprep.subr.bf16.mxu1 %v5491_v30  ;;  %v5510_v30 = vld [vmem:[%s7714_s5 + $0xc8] ss:$16 sps:$4 sm:$0xff]  }
 0x1c7   :  { %2211 = vmatpush1.bf16.msra.mxu0 %v5426_v47  ;;  %v5563_v47 = vld [vmem:[%s7716_s7 + $0x194] ss:$28 sps:$4 sm:$0xff]  }
 0x1c8   :  { %2212 = vmatprep.subr.bf16.mxu0 %v5431_v48  ;;  %2485 = vmatpush1.bf16.msra.mxu1 %v5489_v31  ;;  %v5561_v48 = vld [vmem:[%s7716_s7 + $0x190] ss:$28 sps:$4 sm:$0xff]  }
 0x1c9   :  { %2511 = vmatprep.subr.bf16.mxu1 %v5494_v32  ;;  %v5515_v31 = vld [vmem:[%s7714_s5 + $0xec] ss:$16 sps:$4 sm:$0xff]   ;;  %v5513_v32 = vld [vmem:[%s7714_s5 + $0xe8] ss:$16 sps:$4 sm:$0xff]  }
 0x1cb   :  { %2213 = vmatpush1.bf16.msra.mxu0 %v5429_v49  ;;  %v5569_v49 = vld [vmem:[%s7716_s7 + $0x1cc] ss:$28 sps:$4 sm:$0xff]  }
 0x1cc   :  { %2214 = vmatprep.subr.bf16.mxu0 %v5434_v50  ;;  %v5567_v50 = vld [vmem:[%s7716_s7 + $0x1c8] ss:$28 sps:$4 sm:$0xff]  }
 0x1cf   :  { %2215 = vmatpush1.bf16.msra.mxu0 %v5432_v51  ;;  %v5575_v51 = vld [vmem:[%s7716_s7 + $0x204] ss:$28 sps:$4 sm:$0xff]  }
 0x1d0   :  { %2216 = vmatprep.subr.bf16.mxu0 %v5437_v52  ;;  %v5573_v52 = vld [vmem:[%s7716_s7 + $0x200] ss:$28 sps:$4 sm:$0xff]  }
 0x1d3   :  { %2217 = vmatpush1.bf16.msra.mxu0 %v5435_v53  ;;  %v5581_v53 = vld [vmem:[%s7716_s7 + $0x23c] ss:$28 sps:$4 sm:$0xff]  }
 0x1d4   :  { %2218 = vmatprep.subr.bf16.mxu0 %v5440_v54  ;;  %v5579_v54 = vld [vmem:[%s7716_s7 + $0x238] ss:$28 sps:$4 sm:$0xff]  }
 0x1d7   :  { %2219 = vmatpush1.bf16.msra.mxu0 %v5438_v55  ;;  %v5587_v55 = vld [vmem:[%s7716_s7 + $0x274] ss:$28 sps:$4 sm:$0xff]  }
 0x1d8   :  { %2220 = vmatprep.subr.bf16.mxu0 %v5443_v56  ;;  %v5585_v56 = vld [vmem:[%s7716_s7 + $0x270] ss:$28 sps:$4 sm:$0xff]  }
 0x1db   :  { %2221 = vmatpush1.bf16.msra.mxu0 %v5441_v57  ;;  %v5593_v57 = vld [vmem:[%s7716_s7 + $0x2ac] ss:$28 sps:$4 sm:$0xff]  }
 0x1dc   :  { %2222 = vmatprep.subr.bf16.mxu0 %v5446_v58  ;;  %v5591_v58 = vld [vmem:[%s7716_s7 + $0x2a8] ss:$28 sps:$4 sm:$0xff]  }
 0x1df   :  { %2223 = vmatpush1.bf16.msra.mxu0 %v5444_v59  ;;  %v5599_v59 = vld [vmem:[%s7716_s7 + $0x2e4] ss:$28 sps:$4 sm:$0xff]  }
 0x1e0   :  { %2224 = vmatprep.subr.bf16.mxu0 %v5449_v60  ;;  %v5597_v60 = vld [vmem:[%s7716_s7 + $0x2e0] ss:$28 sps:$4 sm:$0xff]  }
 0x1e3   :  { %2225 = vmatpush1.bf16.msra.mxu0 %v5447_v61  ;;  %v1833_v61 = vld [vmem:[%s7717_s4] sm:$0x3] }
 0x1e4   :  { %2226 = vmatprep.subr.bf16.mxu0 %v5452_v62  ;;  %v1838_v62 = vrot.slane %v1833_v61, %v6740_v18 }
 0x1e7   :  { %2227 = vmatpush1.bf16.msra.mxu0 %v5450_v63  ;;  %v1842_v63 = vrot.slane %v1833_v61, %v6748_v21  ;;  %v5602_v61 = vld [vmem:[%s7716_s7 + $0x314] ss:$28 sps:$4 sm:$0xff]  }
 0x1e8   :  { %2228 = vmatprep.subr.bf16.mxu0 %v5455_v0 }
 0x1eb   :  { %2229 = vmatpush1.bf16.msra.mxu0 %v5453_v1 }
 0x1ec   :  { %2230 = vmatprep.subr.bf16.mxu0 %v5458_v2 }
 0x1ef   :  { %2231 = vmatpush1.bf16.msra.mxu0 %v5456_v3 }
 0x1f0   :  { %2232 = vmatprep.subr.bf16.mxu0 %v5461_v5 }
 0x1f3   :  { %2233 = vmatpush1.bf16.msra.mxu0 %v5459_v6 }
 0x1f4   :  { %2234 = vmatprep.subr.bf16.mxu0 %v5464_v8 }
 0x1f7   :  { %2235 = vmatpush1.bf16.msra.mxu0 %v5462_v9  ;;  %v2252_v9 = vld [vmem:[%s7719_s9] sm:$0xff] }
 0x1f8   :  { %2236 = vmatprep.subr.bf16.mxu0 %v5467_v12 }
 0x1fb   :  { %2237 = vmatpush1.bf16.msra.mxu0 %v5465_v13  ;;  %v5492_v13 = vld [vmem:[%s7714_s5 + $0x8] ss:$16 sps:$4 sm:$0xff]  }
 0x1fc   :  { %4087 = vmatprep.subr.bf16.mxu0 %v5521_v34  ;;  %v5516_v34 = vld [vmem:[%s7716_s7] ss:$28 sps:$4 sm:$0xff]  }
 0x1fe   :  { %2239 = vmatmul.mubr.bf16.vlgmr.msra.gmra.mrb[4].mxu0 %v1767_v11  ;;  %v5497_v11 = vld [vmem:[%s7714_s5 + $0x2c] ss:$16 sps:$4 sm:$0xff]  }
 0x1ff   :  { %4088 = vmatpush1.bf16.msra.mxu0 %v5519_v33  ;;  %v5518_v33 = vld [vmem:[%s7716_s7 + $0x4] ss:$28 sps:$4 sm:$0xff]  }
 0x200   :  { %4089 = vmatprep.subr.bf16.mxu0 %v5527_v36  ;;  %v5522_v36 = vld [vmem:[%s7716_s7 + $0x38] ss:$28 sps:$4 sm:$0xff]  }
 0x203   :  { %4090 = vmatpush1.bf16.msra.mxu0 %v5525_v35  ;;  %v5524_v35 = vld [vmem:[%s7716_s7 + $0x3c] ss:$28 sps:$4 sm:$0xff]  }
 0x204   :  { %4091 = vmatprep.subr.bf16.mxu0 %v5533_v37  ;;  %v5530_v37 = vld [vmem:[%s7716_s7 + $0x74] ss:$28 sps:$4 sm:$0xff]  }
 0x207   :  { %4092 = vmatpush1.bf16.msra.mxu0 %v5531_v38  ;;  %v5528_v38 = vld [vmem:[%s7716_s7 + $0x70] ss:$28 sps:$4 sm:$0xff]  }
 0x208   :  { %4093 = vmatprep.subr.bf16.mxu0 %v5539_v39  ;;  %v5536_v39 = vld [vmem:[%s7716_s7 + $0xac] ss:$28 sps:$4 sm:$0xff]  }
 0x20b   :  { %4094 = vmatpush1.bf16.msra.mxu0 %v5537_v40  ;;  %v5534_v40 = vld [vmem:[%s7716_s7 + $0xa8] ss:$28 sps:$4 sm:$0xff]  }
 0x20c   :  { %4095 = vmatprep.subr.bf16.mxu0 %v5545_v41  ;;  %v5542_v41 = vld [vmem:[%s7716_s7 + $0xe4] ss:$28 sps:$4 sm:$0xff]  }
 0x20f   :  { %4096 = vmatpush1.bf16.msra.mxu0 %v5543_v42  ;;  %v5540_v42 = vld [vmem:[%s7716_s7 + $0xe0] ss:$28 sps:$4 sm:$0xff]  }
 0x210   :  { %4097 = vmatprep.subr.bf16.mxu0 %v5551_v43  ;;  %v5548_v43 = vld [vmem:[%s7716_s7 + $0x11c] ss:$28 sps:$4 sm:$0xff]  }
 0x213   :  { %4098 = vmatpush1.bf16.msra.mxu0 %v5549_v44  ;;  %v5546_v44 = vld [vmem:[%s7716_s7 + $0x118] ss:$28 sps:$4 sm:$0xff]  }
 0x214   :  { %4099 = vmatprep.subr.bf16.mxu0 %v5557_v45  ;;  %v5554_v45 = vld [vmem:[%s7716_s7 + $0x154] ss:$28 sps:$4 sm:$0xff]  }
 0x217   :  { %4100 = vmatpush1.bf16.msra.mxu0 %v5555_v46  ;;  %v5552_v46 = vld [vmem:[%s7716_s7 + $0x150] ss:$28 sps:$4 sm:$0xff]  }
 0x218   :  { %4101 = vmatprep.subr.bf16.mxu0 %v5563_v47  ;;  %v5560_v47 = vld [vmem:[%s7716_s7 + $0x18c] ss:$28 sps:$4 sm:$0xff]  }
 0x21b   :  { %4102 = vmatpush1.bf16.msra.mxu0 %v5561_v48  ;;  %v5558_v48 = vld [vmem:[%s7716_s7 + $0x188] ss:$28 sps:$4 sm:$0xff]  }
 0x21c   :  { %4103 = vmatprep.subr.bf16.mxu0 %v5569_v49  ;;  %v5566_v49 = vld [vmem:[%s7716_s7 + $0x1c4] ss:$28 sps:$4 sm:$0xff]  }
 0x21f   :  { %4104 = vmatpush1.bf16.msra.mxu0 %v5567_v50  ;;  %v5564_v50 = vld [vmem:[%s7716_s7 + $0x1c0] ss:$28 sps:$4 sm:$0xff]  }
 0x220   :  { %4105 = vmatprep.subr.bf16.mxu0 %v5575_v51  ;;  %v5572_v51 = vld [vmem:[%s7716_s7 + $0x1fc] ss:$28 sps:$4 sm:$0xff]  }
 0x223   :  { %4106 = vmatpush1.bf16.msra.mxu0 %v5573_v52  ;;  %v5570_v52 = vld [vmem:[%s7716_s7 + $0x1f8] ss:$28 sps:$4 sm:$0xff]  }
 0x224   :  { %4107 = vmatprep.subr.bf16.mxu0 %v5581_v53  ;;  %v5578_v53 = vld [vmem:[%s7716_s7 + $0x234] ss:$28 sps:$4 sm:$0xff]  }
 0x227   :  { %4108 = vmatpush1.bf16.msra.mxu0 %v5579_v54  ;;  %v5576_v54 = vld [vmem:[%s7716_s7 + $0x230] ss:$28 sps:$4 sm:$0xff]  }
 0x228   :  { %4109 = vmatprep.subr.bf16.mxu0 %v5587_v55  ;;  %v5584_v55 = vld [vmem:[%s7716_s7 + $0x26c] ss:$28 sps:$4 sm:$0xff]  }
 0x22b   :  { %4110 = vmatpush1.bf16.msra.mxu0 %v5585_v56  ;;  %v5582_v56 = vld [vmem:[%s7716_s7 + $0x268] ss:$28 sps:$4 sm:$0xff]  }
 0x22c   :  { %4111 = vmatprep.subr.bf16.mxu0 %v5593_v57  ;;  %v5590_v57 = vld [vmem:[%s7716_s7 + $0x2a4] ss:$28 sps:$4 sm:$0xff]  }
 0x22f   :  { %4112 = vmatpush1.bf16.msra.mxu0 %v5591_v58  ;;  %v5588_v58 = vld [vmem:[%s7716_s7 + $0x2a0] ss:$28 sps:$4 sm:$0xff]  }
 0x230   :  { %4113 = vmatprep.subr.bf16.mxu0 %v5599_v59  ;;  %v5596_v59 = vld [vmem:[%s7716_s7 + $0x2dc] ss:$28 sps:$4 sm:$0xff]  }
 0x233   :  { %4114 = vmatpush1.bf16.msra.mxu0 %v5597_v60  ;;  %v5594_v60 = vld [vmem:[%s7716_s7 + $0x2d8] ss:$28 sps:$4 sm:$0xff]  }
 0x2d1   :  { %v2240_v0 = vpop.f32.mrb[4].mxu0 }
 0x2d2   :  { %v4980_v1 = vadd.f32 %v2240_v0, %v1838_v62  ;;  %v2242_v2 = vpop.f32.mrb[5].mxu0  ;;  %v5605_v62 = vld [vmem:[%s7716_s7 + $0x31c] ss:$28 sps:$4 sm:$0xff]   ;;  %v5600_v0 = vld [vmem:[%s7716_s7 + $0x310] ss:$28 sps:$4 sm:$0xff]  }
 0x2d3   :  { %v4981_v3 = vadd.f32 %v2242_v2, %v1842_v63  ;;  %v2244_v5 = vpop.f32.mrb[6].mxu0  ;;  %v5603_v63 = vld [vmem:[%s7716_s7 + $0x318] ss:$28 sps:$4 sm:$0xff]   ;;  %4115 = vmatprep.subr.bf16.mxu0 %v5605_v62  ;;  %v5665_v62 = vld [vmem:[%s7716_s7 + $0x54c] ss:$28 sps:$4 sm:$0xff]  }
 0x2d4   :  { %2247 = vst [vmem:[%s7718_s11] sm:$0xff] %v4980_v1  ;;  %v2245_v6 = vpop.f32.mrb[7].mxu0  ;;  %4116 = vmatpush1.bf16.msra.mxu0 %v5603_v63  ;;  %v5611_v2 = vld [vmem:[%s7716_s7 + $0x354] ss:$28 sps:$4 sm:$0xff]   ;;  %v5606_v5 = vld [vmem:[%s7716_s7 + $0x348] ss:$28 sps:$4 sm:$0xff]  }
 0x2d5   :  { %2248 = vst [vmem:[%s7718_s11 + $0x8] sm:$0xff] %v4981_v3  ;;  %v2249_v7 = vmul.f32 0.5, %v4981_v3  ;;  %v5609_v3 = vld [vmem:[%s7716_s7 + $0x350] ss:$28 sps:$4 sm:$0xff]   ;;  %4117 = vmatprep.subr.bf16.mxu0 %v5611_v2  ;;  %v5614_v6 = vld [vmem:[%s7716_s7 + $0x384] ss:$28 sps:$4 sm:$0xff]  }
 0x2d6   :  { %v5663_v2 = vld [vmem:[%s7716_s7 + $0x548] ss:$28 sps:$4 sm:$0xff]  }
 0x2d7   :  { %v2250_v8 = vmul.f32 1.442695, %v2249_v7  ;;  %v5617_v7 = vld [vmem:[%s7716_s7 + $0x38c] ss:$28 sps:$4 sm:$0xff]  }
 0x2d8   :  { %4118 = vmatpush1.bf16.msra.mxu0 %v5609_v3  ;;  %v5668_v3 = vld [vmem:[%s7716_s7 + $0x57c] ss:$28 sps:$4 sm:$0xff]  }
 0x2d9   :  { %5836 = vpow2.f32 %v2250_v8  ;;  %4128 = vmatprep.subr.bf16.mxu0 %v5617_v7  ;;  %v7160_v8 = vld [vmem:[%s7720_s6] sm:$0xf] }
 0x2da   :  { %v5669_v7 = vld [vmem:[%s7716_s7 + $0x580] ss:$28 sps:$4 sm:$0xff]  }
 0x2e3   :  { %v5837_v10 = vpop.eup %5836 }
 0x2e4   :  { %v2253_v12 = vmul.f32 %v5837_v10, %v2252_v9  ;;  %v2293_v9 = vrot.slane %v7160_v8, %v6740_v18  ;;  %v2297_v10 = vrot.slane %v7160_v8, %v6748_v21 }
 0x2e6   :  { %v2254_v14 = vadd.f32 %v4980_v1, %v2253_v12  ;;  %v5608_v1 = vld [vmem:[%s7716_s7 + $0x34c] ss:$28 sps:$4 sm:$0xff]  }
 0x2e8   :  { %v2255_v15 = vpack.c.bf16 %v2254_v14, %v2254_v14 }
 0x2ea   :  { %2503 = vmatmul.mubr.bf16.vlgmr.msra.gmra.mrb[4].mxu1 %v2255_v15 }
 0x2eb   :  { %2512 = vmatpush1.bf16.msra.mxu1 %v5492_v13  ;;  %2543 = vmatprep.mubr.bf16.mxu1 %v5866_v19  ;;  %v5506_v19 = vld [vmem:[%s7714_s5 + $0x8c] ss:$16 sps:$4 sm:$0xff]  }
 0x2ec   :  { %2513 = vmatprep.subr.bf16.mxu1 %v5497_v11 }
 0x2ef   :  { %2514 = vmatpush1.bf16.msra.mxu1 %v5495_v16 }
 0x2f0   :  { %2515 = vmatprep.subr.bf16.mxu1 %v5500_v20 }
 0x2f3   :  { %2516 = vmatpush1.bf16.msra.mxu1 %v5498_v23 }
 0x2f4   :  { %2517 = vmatprep.subr.bf16.mxu1 %v5503_v24 }
 0x2f7   :  { %2518 = vmatpush1.bf16.msra.mxu1 %v5501_v25  ;;  %v5612_v25 = vld [vmem:[%s7716_s7 + $0x380] ss:$28 sps:$4 sm:$0xff]  }
 0x2f8   :  { %2519 = vmatprep.subr.bf16.mxu1 %v5506_v19  ;;  %v5615_v19 = vld [vmem:[%s7716_s7 + $0x388] ss:$28 sps:$4 sm:$0xff]  }
 0x2fb   :  { %2520 = vmatpush1.bf16.msra.mxu1 %v5504_v26 }
 0x2fc   :  { %2521 = vmatprep.subr.bf16.mxu1 %v5509_v27  ;;  %v5620_v27 = vld [vmem:[%s7716_s7 + $0x3bc] ss:$28 sps:$4 sm:$0xff]  }
 0x2ff   :  { %2522 = vmatpush1.bf16.msra.mxu1 %v5507_v28  ;;  %v5623_v28 = vld [vmem:[%s7716_s7 + $0x3c4] ss:$28 sps:$4 sm:$0xff]  }
 0x300   :  { %2523 = vmatprep.subr.bf16.mxu1 %v5512_v29  ;;  %v5618_v29 = vld [vmem:[%s7716_s7 + $0x3b8] ss:$28 sps:$4 sm:$0xff]  }
 0x303   :  { %2524 = vmatpush1.bf16.msra.mxu1 %v5510_v30  ;;  %v5621_v30 = vld [vmem:[%s7716_s7 + $0x3c0] ss:$28 sps:$4 sm:$0xff]  }
 0x304   :  { %2525 = vmatprep.subr.bf16.mxu1 %v5515_v31  ;;  %v5626_v31 = vld [vmem:[%s7716_s7 + $0x3f4] ss:$28 sps:$4 sm:$0xff]  }
 0x307   :  { %2526 = vmatpush1.bf16.msra.mxu1 %v5513_v32  ;;  %v5629_v32 = vld [vmem:[%s7716_s7 + $0x3fc] ss:$28 sps:$4 sm:$0xff]  }
 0x308   :  { %4005 = vmatprep.subr.bf16.mxu1 %v5518_v33  ;;  %v5624_v33 = vld [vmem:[%s7716_s7 + $0x3f0] ss:$28 sps:$4 sm:$0xff]  }
 0x30a   :  { %2544 = vmatmul.mubr.bf16.vlgmr.msra.gmra.mrb[8].mxu1 %v2255_v15 }
 0x30b   :  { %4006 = vmatpush1.bf16.msra.mxu1 %v5516_v34  ;;  %v5627_v34 = vld [vmem:[%s7716_s7 + $0x3f8] ss:$28 sps:$4 sm:$0xff]  }
 0x30c   :  { %4007 = vmatprep.subr.bf16.mxu1 %v5524_v35  ;;  %v5632_v35 = vld [vmem:[%s7716_s7 + $0x42c] ss:$28 sps:$4 sm:$0xff]  }
 0x30f   :  { %4008 = vmatpush1.bf16.msra.mxu1 %v5522_v36  ;;  %v5635_v36 = vld [vmem:[%s7716_s7 + $0x434] ss:$28 sps:$4 sm:$0xff]  }
 0x310   :  { %4009 = vmatprep.subr.bf16.mxu1 %v5530_v37  ;;  %v5630_v37 = vld [vmem:[%s7716_s7 + $0x428] ss:$28 sps:$4 sm:$0xff]  }
 0x313   :  { %4010 = vmatpush1.bf16.msra.mxu1 %v5528_v38  ;;  %v5633_v38 = vld [vmem:[%s7716_s7 + $0x430] ss:$28 sps:$4 sm:$0xff]  }
 0x314   :  { %4011 = vmatprep.subr.bf16.mxu1 %v5536_v39  ;;  %v5638_v39 = vld [vmem:[%s7716_s7 + $0x464] ss:$28 sps:$4 sm:$0xff]  }
 0x317   :  { %4012 = vmatpush1.bf16.msra.mxu1 %v5534_v40  ;;  %v5641_v40 = vld [vmem:[%s7716_s7 + $0x46c] ss:$28 sps:$4 sm:$0xff]  }
 0x318   :  { %4013 = vmatprep.subr.bf16.mxu1 %v5542_v41  ;;  %v5636_v41 = vld [vmem:[%s7716_s7 + $0x460] ss:$28 sps:$4 sm:$0xff]  }
 0x31b   :  { %4014 = vmatpush1.bf16.msra.mxu1 %v5540_v42  ;;  %v5639_v42 = vld [vmem:[%s7716_s7 + $0x468] ss:$28 sps:$4 sm:$0xff]  }
 0x31c   :  { %4015 = vmatprep.subr.bf16.mxu1 %v5548_v43  ;;  %v5644_v43 = vld [vmem:[%s7716_s7 + $0x49c] ss:$28 sps:$4 sm:$0xff]  }
 0x31f   :  { %4016 = vmatpush1.bf16.msra.mxu1 %v5546_v44  ;;  %v5647_v44 = vld [vmem:[%s7716_s7 + $0x4a4] ss:$28 sps:$4 sm:$0xff]  }
 0x320   :  { %4017 = vmatprep.subr.bf16.mxu1 %v5554_v45  ;;  %v5642_v45 = vld [vmem:[%s7716_s7 + $0x498] ss:$28 sps:$4 sm:$0xff]  }
 0x323   :  { %4018 = vmatpush1.bf16.msra.mxu1 %v5552_v46  ;;  %v5645_v46 = vld [vmem:[%s7716_s7 + $0x4a0] ss:$28 sps:$4 sm:$0xff]  }
 0x324   :  { %4019 = vmatprep.subr.bf16.mxu1 %v5560_v47  ;;  %v5650_v47 = vld [vmem:[%s7716_s7 + $0x4d4] ss:$28 sps:$4 sm:$0xff]  }
 0x327   :  { %4020 = vmatpush1.bf16.msra.mxu1 %v5558_v48  ;;  %v5653_v48 = vld [vmem:[%s7716_s7 + $0x4dc] ss:$28 sps:$4 sm:$0xff]  }
 0x328   :  { %4021 = vmatprep.subr.bf16.mxu1 %v5566_v49  ;;  %v2305_v49 = vrot.slane %v7160_v8, %v6751_v22 }
 0x32b   :  { %4022 = vmatpush1.bf16.msra.mxu1 %v5564_v50  ;;  %v5648_v50 = vld [vmem:[%s7716_s7 + $0x4d0] ss:$28 sps:$4 sm:$0xff]  }
 0x32c   :  { %4023 = vmatprep.subr.bf16.mxu1 %v5572_v51  ;;  %v5651_v51 = vld [vmem:[%s7716_s7 + $0x4d8] ss:$28 sps:$4 sm:$0xff]  }
 0x32f   :  { %4024 = vmatpush1.bf16.msra.mxu1 %v5570_v52  ;;  %v5656_v52 = vld [vmem:[%s7716_s7 + $0x50c] ss:$28 sps:$4 sm:$0xff]  }
 0x330   :  { %4025 = vmatprep.subr.bf16.mxu1 %v5578_v53  ;;  %v5659_v53 = vld [vmem:[%s7716_s7 + $0x514] ss:$28 sps:$4 sm:$0xff]  }
 0x333   :  { %4026 = vmatpush1.bf16.msra.mxu1 %v5576_v54 }
 0x334   :  { %4027 = vmatprep.subr.bf16.mxu1 %v5584_v55 }
 0x337   :  { %4028 = vmatpush1.bf16.msra.mxu1 %v5582_v56 }
 0x338   :  { %4029 = vmatprep.subr.bf16.mxu1 %v5590_v57 }
 0x33b   :  { %4030 = vmatpush1.bf16.msra.mxu1 %v5588_v58  ;;  %v5654_v58 = vld [vmem:[%s7716_s7 + $0x508] ss:$28 sps:$4 sm:$0xff]  }
 0x33c   :  { %4031 = vmatprep.subr.bf16.mxu1 %v5596_v59  ;;  %v5657_v59 = vld [vmem:[%s7716_s7 + $0x510] ss:$28 sps:$4 sm:$0xff]  }
 0x33f   :  { %4032 = vmatpush1.bf16.msra.mxu1 %v5594_v60 }
 0x340   :  { %4033 = vmatprep.subr.bf16.mxu1 %v5602_v61  ;;  %v5662_v61 = vld [vmem:[%s7716_s7 + $0x544] ss:$28 sps:$4 sm:$0xff]  }
 0x343   :  { %4034 = vmatpush1.bf16.msra.mxu1 %v5600_v0 }
 0x344   :  { %4035 = vmatprep.subr.bf16.mxu1 %v5608_v1  ;;  %v5660_v1 = vld [vmem:[%s7716_s7 + $0x540] ss:$28 sps:$4 sm:$0xff]  }
 0x347   :  { %4036 = vmatpush1.bf16.msra.mxu1 %v5606_v5  ;;  %v5671_v5 = vld [vmem:[%s7716_s7 + $0x584] ss:$28 sps:$4 sm:$0xff]  }
 0x348   :  { %4046 = vmatprep.subr.bf16.mxu1 %v5614_v6  ;;  %v5666_v6 = vld [vmem:[%s7716_s7 + $0x578] ss:$28 sps:$4 sm:$0xff]  }
 0x3bd   :  { %v2504_v12 = vpop.f32.mrb[4].mxu1 }
 0x3be   :  { %v2505_v13 = vadd.f32 %v2504_v12, %v2293_v9  ;;  %v2506_v14 = vpop.f32.mrb[5].mxu1  ;;  %v5674_v9 = vld [vmem:[%s7716_s7 + $0x5b4] ss:$28 sps:$4 sm:$0xff]  }
 0x3bf   :  { %v2507_v11 = vadd.f32 %v2506_v14, %v2297_v10  ;;  %v2508_v15 = vpop.f32.mrb[6].mxu1  ;;  %v5677_v10 = vld [vmem:[%s7716_s7 + $0x5bc] ss:$28 sps:$4 sm:$0xff]   ;;  %v5672_v12 = vld [vmem:[%s7716_s7 + $0x5b0] ss:$28 sps:$4 sm:$0xff]  }
 0x3c0   :  { %v2552_v16 = vmax.f32 %v2505_v13, 0.0  ;;  %v2509_v20 = vpop.f32.mrb[7].mxu1  ;;  %v5675_v13 = vld [vmem:[%s7716_s7 + $0x5b8] ss:$28 sps:$4 sm:$0xff]   ;;  %v5680_v14 = vld [vmem:[%s7716_s7 + $0x5ec] ss:$28 sps:$4 sm:$0xff]  }
 0x3c1   :  { %v2553_v23 = vmax.f32 %v2507_v11, 0.0  ;;  %v5683_v11 = vld [vmem:[%s7716_s7 + $0x5f4] ss:$28 sps:$4 sm:$0xff]   ;;  %v5678_v15 = vld [vmem:[%s7716_s7 + $0x5e8] ss:$28 sps:$4 sm:$0xff]  }
 0x3c2   :  { %v7174_v26 = vpack.c.bf16 %v2552_v16, %v2552_v16  ;;  %v5681_v16 = vld [vmem:[%s7716_s7 + $0x5f0] ss:$28 sps:$4 sm:$0xff]   ;;  %v5686_v20 = vld [vmem:[%s7716_s7 + $0x624] ss:$28 sps:$4 sm:$0xff]  }
 0x3c3   :  { %v7166_v24 = vpack.c.bf16 %v2553_v23, %v2553_v23  ;;  %v5689_v23 = vld [vmem:[%s7716_s7 + $0x62c] ss:$28 sps:$4 sm:$0xff]  }
 0x3c5   :  { %4037 = vmatprep.mubr.bf16.mxu1 %v7166_v24  ;;  %4119 = vmatprep.mubr.bf16.mxu0 %v7166_v24 }
 0x3c6   :  { %4038 = vmatmul.mubr.bf16.vlgmr.msra.gmra.mrb[12].mxu1 %v7174_v26  ;;  %4120 = vmatmul.mubr.bf16.vlgmr.msra.gmra.mrb[8].mxu0 %v7174_v26 }
 0x3c7   :  { %4047 = vmatpush1.bf16.msra.mxu1 %v5612_v25  ;;  %4129 = vmatpush1.bf16.msra.mxu0 %v5615_v19  ;;  %v5684_v25 = vld [vmem:[%s7716_s7 + $0x620] ss:$28 sps:$4 sm:$0xff]   ;;  %v5687_v19 = vld [vmem:[%s7716_s7 + $0x628] ss:$28 sps:$4 sm:$0xff]  }
 0x3c8   :  { %4048 = vmatprep.subr.bf16.mxu1 %v5620_v27  ;;  %4130 = vmatprep.subr.bf16.mxu0 %v5623_v28  ;;  %v5692_v27 = vld [vmem:[%s7716_s7 + $0x65c] ss:$28 sps:$4 sm:$0xff]   ;;  %v5695_v28 = vld [vmem:[%s7716_s7 + $0x664] ss:$28 sps:$4 sm:$0xff]  }
 0x3cb   :  { %4049 = vmatpush1.bf16.msra.mxu1 %v5618_v29  ;;  %4131 = vmatpush1.bf16.msra.mxu0 %v5621_v30  ;;  %v5690_v29 = vld [vmem:[%s7716_s7 + $0x658] ss:$28 sps:$4 sm:$0xff]   ;;  %v5693_v30 = vld [vmem:[%s7716_s7 + $0x660] ss:$28 sps:$4 sm:$0xff]  }
 0x3cc   :  { %4050 = vmatprep.subr.bf16.mxu1 %v5626_v31  ;;  %4132 = vmatprep.subr.bf16.mxu0 %v5629_v32  ;;  %v2301_v31 = vrot.slane %v7160_v8, %v6837_v4  ;;  %v5698_v32 = vld [vmem:[%s7716_s7 + $0x694] ss:$28 sps:$4 sm:$0xff]  }
 0x3cd   :  { %v5699_v8 = vld [vmem:[%s7716_s7 + $0x698] ss:$28 sps:$4 sm:$0xff]  }
 0x3cf   :  { %4051 = vmatpush1.bf16.msra.mxu1 %v5624_v33  ;;  %4133 = vmatpush1.bf16.msra.mxu0 %v5627_v34  ;;  %v5701_v33 = vld [vmem:[%s7716_s7 + $0x69c] ss:$28 sps:$4 sm:$0xff]   ;;  %v5696_v34 = vld [vmem:[%s7716_s7 + $0x690] ss:$28 sps:$4 sm:$0xff]  }
 0x3d0   :  { %4052 = vmatprep.subr.bf16.mxu1 %v5632_v35  ;;  %4134 = vmatprep.subr.bf16.mxu0 %v5635_v36  ;;  %v5704_v36 = vld [vmem:[%s7716_s7 + $0x6cc] ss:$28 sps:$4 sm:$0xff]  }
 0x3d3   :  { %4053 = vmatpush1.bf16.msra.mxu1 %v5630_v37  ;;  %4135 = vmatpush1.bf16.msra.mxu0 %v5633_v38  ;;  %v5707_v37 = vld [vmem:[%s7716_s7 + $0x6d4] ss:$28 sps:$4 sm:$0xff]   ;;  %v5702_v38 = vld [vmem:[%s7716_s7 + $0x6c8] ss:$28 sps:$4 sm:$0xff]  }
 0x3d4   :  { %4054 = vmatprep.subr.bf16.mxu1 %v5638_v39  ;;  %4136 = vmatprep.subr.bf16.mxu0 %v5641_v40  ;;  %v5705_v39 = vld [vmem:[%s7716_s7 + $0x6d0] ss:$28 sps:$4 sm:$0xff]  }
 0x3d7   :  { %4055 = vmatpush1.bf16.msra.mxu1 %v5636_v41  ;;  %4137 = vmatpush1.bf16.msra.mxu0 %v5639_v42  ;;  %v5710_v41 = vld [vmem:[%s7716_s7 + $0x14] ss:$28 sps:$4 sm:$0xff]  }
 0x3d8   :  { %4056 = vmatprep.subr.bf16.mxu1 %v5644_v43  ;;  %4138 = vmatprep.subr.bf16.mxu0 %v5647_v44  ;;  %v5711_v42 = vld [vmem:[%s7716_s7 + $0x1d8] ss:$28 sps:$4 sm:$0xff]   ;;  %v5708_v43 = vld [vmem:[%s7716_s7 + $0x10] ss:$28 sps:$4 sm:$0xff]  }
 0x3db   :  { %4057 = vmatpush1.bf16.msra.mxu1 %v5642_v45  ;;  %4139 = vmatpush1.bf16.msra.mxu0 %v5645_v46  ;;  %v5712_v45 = vld [vmem:[%s7716_s7 + $0x18] ss:$28 sps:$4 sm:$0xff]   ;;  %v5715_v46 = vld [vmem:[%s7716_s7 + $0x4c] ss:$28 sps:$4 sm:$0xff]  }
 0x3dc   :  { %4058 = vmatprep.subr.bf16.mxu1 %v5650_v47  ;;  %4140 = vmatprep.subr.bf16.mxu0 %v5653_v48  ;;  %v5716_v47 = vld [vmem:[%s7716_s7 + $0x210] ss:$28 sps:$4 sm:$0xff]   ;;  %v5713_v48 = vld [vmem:[%s7716_s7 + $0x48] ss:$28 sps:$4 sm:$0xff]  }
 0x3dd   :  { %v7260_v54 = vpop.f32.mrb[8].mxu1 }
 0x3de   :  { %v2547_v55 = vpop.f32.mrb[9].mxu1  ;;  %v2546_v35 = vadd.f32 %v7260_v54, %v2301_v31  ;;  %v5726_v54 = vld [vmem:[%s7716_s7 + $0x280] ss:$28 sps:$4 sm:$0xff]  }
 0x3df   :  { %v2548_v56 = vadd.f32 %v2547_v55, %v2305_v49  ;;  %v2549_v57 = vpop.f32.mrb[10].mxu1  ;;  %4059 = vmatpush1.bf16.msra.mxu1 %v5648_v50  ;;  %4141 = vmatpush1.bf16.msra.mxu0 %v5651_v51  ;;  %v5717_v49 = vld [vmem:[%s7716_s7 + $0x50] ss:$28 sps:$4 sm:$0xff]   ;;  %v5720_v50 = vld [vmem:[%s7716_s7 + $0x84] ss:$28 sps:$4 sm:$0xff]  }
 0x3e0   :  { %v2550_v60 = vpop.f32.mrb[11].mxu1  ;;  %4060 = vmatprep.subr.bf16.mxu1 %v5656_v52  ;;  %4142 = vmatprep.subr.bf16.mxu0 %v5659_v53  ;;  %v2554_v40 = vmax.f32 %v2546_v35, 0.0  ;;  %v5721_v51 = vld [vmem:[%s7716_s7 + $0x248] ss:$28 sps:$4 sm:$0xff]   ;;  %v5718_v52 = vld [vmem:[%s7716_s7 + $0x80] ss:$28 sps:$4 sm:$0xff]  }
 0x3e1   :  { %v2555_v63 = vmax.f32 %v2548_v56, 0.0  ;;  %v5725_v53 = vld [vmem:[%s7716_s7 + $0xbc] ss:$28 sps:$4 sm:$0xff]   ;;  %v5730_v57 = vld [vmem:[%s7716_s7 + $0xf4] ss:$28 sps:$4 sm:$0xff]  }
 0x3e2   :  { %v7380_v44 = vpack.c.bf16 %v2554_v40, %v2554_v40  ;;  %v5723_v55 = vld [vmem:[%s7716_s7 + $0xb8] ss:$28 sps:$4 sm:$0xff]   ;;  %v5727_v56 = vld [vmem:[%s7716_s7 + $0xc0] ss:$28 sps:$4 sm:$0xff]   ;;  %v5768_v35 = vld [vmem:[%s7716_s7 + $0x2b0] ss:$28 sps:$4 sm:$0xff]  }
 0x3e3   :  { %v7274_v0 = vpack.c.bf16 %v2555_v63, %v2555_v63  ;;  %4061 = vmatpush1.bf16.msra.mxu1 %v5654_v58  ;;  %4143 = vmatpush1.bf16.msra.mxu0 %v5657_v59  ;;  %v5731_v58 = vld [vmem:[%s7716_s7 + $0x2b8] ss:$28 sps:$4 sm:$0xff]   ;;  %v5728_v59 = vld [vmem:[%s7716_s7 + $0xf0] ss:$28 sps:$4 sm:$0xff]   ;;  %v5733_v63 = vld [vmem:[%s7716_s7 + $0x128] ss:$28 sps:$4 sm:$0xff]  }
 0x3e4   :  { %4062 = vmatprep.subr.bf16.mxu1 %v5662_v61  ;;  %4144 = vmatprep.subr.bf16.mxu0 %v5665_v62  ;;  %v5732_v60 = vld [vmem:[%s7716_s7 + $0xf8] ss:$28 sps:$4 sm:$0xff]   ;;  %v5735_v61 = vld [vmem:[%s7716_s7 + $0x12c] ss:$28 sps:$4 sm:$0xff]   ;;  %v5766_v31 = vld [vmem:[%s7716_s7 + $0x600] ss:$28 sps:$4 sm:$0xff]  }
 0x3e5   :  { %4078 = vmatprep.mubr.bf16.mxu1 %v7274_v0  ;;  %4160 = vmatprep.mubr.bf16.mxu0 %v7274_v0  ;;  %v5736_v62 = vld [vmem:[%s7716_s7 + $0x2f0] ss:$28 sps:$4 sm:$0xff]  }
 0x3e6   :  { %v5777_v40 = vld [vmem:[%s7716_s7 + $0x4b0] ss:$28 sps:$4 sm:$0xff]  }
 0x3e7   :  { %4063 = vmatpush1.bf16.msra.mxu1 %v5660_v1  ;;  %4145 = vmatpush1.bf16.msra.mxu0 %v5663_v2  ;;  %v5737_v1 = vld [vmem:[%s7716_s7 + $0x130] ss:$28 sps:$4 sm:$0xff]   ;;  %v5740_v2 = vld [vmem:[%s7716_s7 + $0x164] ss:$28 sps:$4 sm:$0xff]  }
 0x3e8   :  { %4064 = vmatprep.subr.bf16.mxu1 %v5668_v3  ;;  %4146 = vmatprep.subr.bf16.mxu0 %v5671_v5  ;;  %v5741_v3 = vld [vmem:[%s7716_s7 + $0x328] ss:$28 sps:$4 sm:$0xff]   ;;  %v5738_v5 = vld [vmem:[%s7716_s7 + $0x160] ss:$28 sps:$4 sm:$0xff]  }
 0x3eb   :  { %4065 = vmatpush1.bf16.msra.mxu1 %v5666_v6  ;;  %4147 = vmatpush1.bf16.msra.mxu0 %v5669_v7  ;;  %v5742_v6 = vld [vmem:[%s7716_s7 + $0x168] ss:$28 sps:$4 sm:$0xff]   ;;  %v5745_v7 = vld [vmem:[%s7716_s7 + $0x19c] ss:$28 sps:$4 sm:$0xff]  }
 0x3ec   :  { %4066 = vmatprep.subr.bf16.mxu1 %v5674_v9  ;;  %4148 = vmatprep.subr.bf16.mxu0 %v5677_v10  ;;  %v5746_v9 = vld [vmem:[%s7716_s7 + $0x360] ss:$28 sps:$4 sm:$0xff]   ;;  %v5743_v10 = vld [vmem:[%s7716_s7 + $0x198] ss:$28 sps:$4 sm:$0xff]  }
 0x3ef   :  { %4067 = vmatpush1.bf16.msra.mxu1 %v5672_v12  ;;  %4149 = vmatpush1.bf16.msra.mxu0 %v5675_v13  ;;  %v5747_v12 = vld [vmem:[%s7716_s7 + $0x1a0] ss:$28 sps:$4 sm:$0xff]   ;;  %v5750_v13 = vld [vmem:[%s7716_s7 + $0x1d4] ss:$28 sps:$4 sm:$0xff]  }
 0x3f0   :  { %4068 = vmatprep.subr.bf16.mxu1 %v5680_v14  ;;  %4150 = vmatprep.subr.bf16.mxu0 %v5683_v11  ;;  %v5751_v14 = vld [vmem:[%s7716_s7 + $0x558] ss:$28 sps:$4 sm:$0xff]   ;;  %v5748_v11 = vld [vmem:[%s7716_s7 + $0x1d0] ss:$28 sps:$4 sm:$0xff]  }
 0x3f3   :  { %4069 = vmatpush1.bf16.msra.mxu1 %v5678_v15  ;;  %4151 = vmatpush1.bf16.msra.mxu0 %v5681_v16  ;;  %v5752_v15 = vld [vmem:[%s7716_s7 + $0x398] ss:$28 sps:$4 sm:$0xff]   ;;  %v5755_v16 = vld [vmem:[%s7716_s7 + $0x20c] ss:$28 sps:$4 sm:$0xff]  }
 0x3f4   :  { %4070 = vmatprep.subr.bf16.mxu1 %v5686_v20  ;;  %4152 = vmatprep.subr.bf16.mxu0 %v5689_v23  ;;  %v5756_v20 = vld [vmem:[%s7716_s7 + $0x590] ss:$28 sps:$4 sm:$0xff]   ;;  %v5753_v23 = vld [vmem:[%s7716_s7 + $0x208] ss:$28 sps:$4 sm:$0xff]  }
 0x3f7   :  { %4071 = vmatpush1.bf16.msra.mxu1 %v5684_v25  ;;  %4153 = vmatpush1.bf16.msra.mxu0 %v5687_v19  ;;  %v5757_v25 = vld [vmem:[%s7716_s7 + $0x3d0] ss:$28 sps:$4 sm:$0xff]   ;;  %v5760_v19 = vld [vmem:[%s7716_s7 + $0x244] ss:$28 sps:$4 sm:$0xff]  }
 0x3f8   :  { %4072 = vmatprep.subr.bf16.mxu1 %v5692_v27  ;;  %4154 = vmatprep.subr.bf16.mxu0 %v5695_v28  ;;  %v5761_v27 = vld [vmem:[%s7716_s7 + $0x5c8] ss:$28 sps:$4 sm:$0xff]   ;;  %v5758_v28 = vld [vmem:[%s7716_s7 + $0x240] ss:$28 sps:$4 sm:$0xff]  }
 0x3fb   :  { %4073 = vmatpush1.bf16.msra.mxu1 %v5690_v29  ;;  %4155 = vmatpush1.bf16.msra.mxu0 %v5693_v30  ;;  %v5762_v29 = vld [vmem:[%s7716_s7 + $0x408] ss:$28 sps:$4 sm:$0xff]   ;;  %v5765_v30 = vld [vmem:[%s7716_s7 + $0x27c] ss:$28 sps:$4 sm:$0xff]  }
 0x3fc   :  { %4074 = vmatprep.subr.bf16.mxu1 %v5698_v32  ;;  %4156 = vmatprep.subr.bf16.mxu0 %v5701_v33  ;;  %v5763_v32 = vld [vmem:[%s7716_s7 + $0x278] ss:$28 sps:$4 sm:$0xff]   ;;  %v5767_v33 = vld [vmem:[%s7716_s7 + $0x440] ss:$28 sps:$4 sm:$0xff]  }
 0x3ff   :  { %4075 = vmatpush1.bf16.msra.mxu1 %v5696_v34  ;;  %4157 = vmatpush1.bf16.msra.mxu0 %v5699_v8  ;;  %v5770_v34 = vld [vmem:[%s7716_s7 + $0x2b4] ss:$28 sps:$4 sm:$0xff]  }
 0x400   :  { %4076 = vmatprep.subr.bf16.mxu1 %v5704_v36  ;;  %4158 = vmatprep.subr.bf16.mxu0 %v5707_v37  ;;  %v5771_v8 = vld [vmem:[%s7716_s7 + $0x638] ss:$28 sps:$4 sm:$0xff]   ;;  %v5775_v37 = vld [vmem:[%s7716_s7 + $0x2ec] ss:$28 sps:$4 sm:$0xff]  }
 0x401   :  { %v5772_v36 = vld [vmem:[%s7716_s7 + $0x478] ss:$28 sps:$4 sm:$0xff]  }
 0x403   :  { %4077 = vmatpush1.bf16.msra.mxu1 %v5702_v38  ;;  %4159 = vmatpush1.bf16.msra.mxu0 %v5705_v39  ;;  %v5776_v38 = vld [vmem:[%s7716_s7 + $0x670] ss:$28 sps:$4 sm:$0xff]   ;;  %v5773_v39 = vld [vmem:[%s7716_s7 + $0x2e8] ss:$28 sps:$4 sm:$0xff]  }
 0x404   :  { %4169 = vmatprep.subr.bf16.mxu1 %v5710_v41  ;;  %4932 = vmatprep.subr.bf16.mxu0 %v5711_v42  ;;  %v5780_v41 = vld [vmem:[%s7716_s7 + $0x324] ss:$28 sps:$4 sm:$0xff]  }
 0x405   :  { %v5781_v42 = vld [vmem:[%s7716_s7 + $0x6a8] ss:$28 sps:$4 sm:$0xff]  }
 0x406   :  { %4079 = vmatmul.mubr.bf16.vlgmr.msra.gmra.mrb[12].mxu1 %v7380_v44  ;;  %4161 = vmatmul.mubr.bf16.vlgmr.msra.gmra.mrb[8].mxu0 %v7380_v44 }
 0x407   :  { %4170 = vmatpush1.bf16.msra.mxu1 %v5708_v43  ;;  %4201 = vmatprep.mubr.bf16.mxu1 %v7166_v24  ;;  %v5778_v43 = vld [vmem:[%s7716_s7 + $0x320] ss:$28 sps:$4 sm:$0xff]  }
 0x408   :  { %4933 = vmatpush3.bf16.msra.mxu0 %v5712_v45  ;;  %4283 = vmatprep.mubr.bf16.mxu0 %v7166_v24  ;;  %v5722_v24 = vld [vmem:[%s7716_s7 + $0x88] ss:$28 sps:$4 sm:$0xff]  }
 0x409   :  { %4171 = vmatprep.subr.bf16.mxu1 %v5715_v46  ;;  %4934 = vmatprep.subr.bf16.mxu0 %v5716_v47  ;;  %v5782_v45 = vld [vmem:[%s7716_s7 + $0x4e8] ss:$28 sps:$4 sm:$0xff]   ;;  %v5785_v46 = vld [vmem:[%s7716_s7 + $0x35c] ss:$28 sps:$4 sm:$0xff]  }
 0x40a   :  { %v5786_v47 = vld [vmem:[%s7716_s7 + $0x6e0] ss:$28 sps:$4 sm:$0xff]  }
 0x40b   :  { %4172 = vmatpush1.bf16.msra.mxu1 %v5713_v48  ;;  %v5783_v48 = vld [vmem:[%s7716_s7 + $0x358] ss:$28 sps:$4 sm:$0xff]  }
 0x40c   :  { %4935 = vmatpush3.bf16.msra.mxu0 %v5717_v49  ;;  %4173 = vmatprep.subr.bf16.mxu1 %v5720_v50  ;;  %v5787_v49 = vld [vmem:[%s7716_s7 + $0x520] ss:$28 sps:$4 sm:$0xff]   ;;  %v5790_v50 = vld [vmem:[%s7716_s7 + $0x394] ss:$28 sps:$4 sm:$0xff]  }
 0x40d   :  { %4936 = vmatprep.subr.bf16.mxu0 %v5721_v51  ;;  %v5788_v51 = vld [vmem:[%s7716_s7 + $0x390] ss:$28 sps:$4 sm:$0xff]  }
 0x40f   :  { %4174 = vmatpush1.bf16.msra.mxu1 %v5718_v52  ;;  %v5793_v52 = vld [vmem:[%s7716_s7 + $0x3cc] ss:$28 sps:$4 sm:$0xff]  }
 0x410   :  { %4937 = vmatpush3.bf16.msra.mxu0 %v5722_v24  ;;  %4175 = vmatprep.subr.bf16.mxu1 %v5725_v53  ;;  %v5791_v24 = vld [vmem:[%s7716_s7 + $0x3c8] ss:$28 sps:$4 sm:$0xff]  }
 0x411   :  { %4938 = vmatprep.subr.bf16.mxu0 %v5726_v54  ;;  %v5796_v53 = vld [vmem:[%s7716_s7 + $0x404] ss:$28 sps:$4 sm:$0xff]  }
 0x412   :  { %v5794_v54 = vld [vmem:[%s7716_s7 + $0x400] ss:$28 sps:$4 sm:$0xff]  }
 0x413   :  { %4176 = vmatpush1.bf16.msra.mxu1 %v5723_v55  ;;  %v5802_v55 = vld [vmem:[%s7716_s7 + $0x474] ss:$28 sps:$4 sm:$0xff]  }
 0x414   :  { %4939 = vmatpush3.bf16.msra.mxu0 %v5727_v56  ;;  %4177 = vmatprep.subr.bf16.mxu1 %v5730_v57  ;;  %v5800_v56 = vld [vmem:[%s7716_s7 + $0x470] ss:$28 sps:$4 sm:$0xff]  }
 0x415   :  { %4940 = vmatprep.subr.bf16.mxu0 %v5731_v58  ;;  %v5805_v57 = vld [vmem:[%s7716_s7 + $0x4ac] ss:$28 sps:$4 sm:$0xff]  }
 0x416   :  { %v5803_v58 = vld [vmem:[%s7716_s7 + $0x4a8] ss:$28 sps:$4 sm:$0xff]  }
 0x417   :  { %4178 = vmatpush1.bf16.msra.mxu1 %v5728_v59  ;;  %v5808_v59 = vld [vmem:[%s7716_s7 + $0x4e4] ss:$28 sps:$4 sm:$0xff]  }
 0x418   :  { %4941 = vmatpush3.bf16.msra.mxu0 %v5732_v60  ;;  %4179 = vmatprep.subr.bf16.mxu1 %v5735_v61  ;;  %v5806_v60 = vld [vmem:[%s7716_s7 + $0x4e0] ss:$28 sps:$4 sm:$0xff]  }
 0x419   :  { %4942 = vmatprep.subr.bf16.mxu0 %v5736_v62  ;;  %v5811_v61 = vld [vmem:[%s7716_s7 + $0x51c] ss:$28 sps:$4 sm:$0xff]  }
 0x41a   :  { %v5809_v62 = vld [vmem:[%s7716_s7 + $0x518] ss:$28 sps:$4 sm:$0xff]  }
 0x41b   :  { %4180 = vmatpush1.bf16.msra.mxu1 %v5733_v63  ;;  %v5814_v63 = vld [vmem:[%s7716_s7 + $0x554] ss:$28 sps:$4 sm:$0xff]  }
 0x41c   :  { %4943 = vmatpush3.bf16.msra.mxu0 %v5737_v1  ;;  %4181 = vmatprep.subr.bf16.mxu1 %v5740_v2  ;;  %v5812_v1 = vld [vmem:[%s7716_s7 + $0x550] ss:$28 sps:$4 sm:$0xff]  }
 0x41d   :  { %4944 = vmatprep.subr.bf16.mxu0 %v5741_v3  ;;  %v5817_v2 = vld [vmem:[%s7716_s7 + $0x58c] ss:$28 sps:$4 sm:$0xff]  }
 0x41e   :  { %v5815_v3 = vld [vmem:[%s7716_s7 + $0x588] ss:$28 sps:$4 sm:$0xff]  }
 0x41f   :  { %4182 = vmatpush1.bf16.msra.mxu1 %v5738_v5  ;;  %v5820_v5 = vld [vmem:[%s7716_s7 + $0x5c4] ss:$28 sps:$4 sm:$0xff]  }
 0x420   :  { %4945 = vmatpush3.bf16.msra.mxu0 %v5742_v6  ;;  %4183 = vmatprep.subr.bf16.mxu1 %v5745_v7  ;;  %v5818_v6 = vld [vmem:[%s7716_s7 + $0x5c0] ss:$28 sps:$4 sm:$0xff]  }
 0x421   :  { %4946 = vmatprep.subr.bf16.mxu0 %v5746_v9  ;;  %v5823_v7 = vld [vmem:[%s7716_s7 + $0x5fc] ss:$28 sps:$4 sm:$0xff]  }
 0x422   :  { %v5821_v9 = vld [vmem:[%s7716_s7 + $0x5f8] ss:$28 sps:$4 sm:$0xff]  }
 0x423   :  { %4184 = vmatpush1.bf16.msra.mxu1 %v5743_v10  ;;  %v5826_v10 = vld [vmem:[%s7716_s7 + $0x634] ss:$28 sps:$4 sm:$0xff]  }
 0x424   :  { %4947 = vmatpush3.bf16.msra.mxu0 %v5747_v12  ;;  %4185 = vmatprep.subr.bf16.mxu1 %v5750_v13  ;;  %v5824_v12 = vld [vmem:[%s7716_s7 + $0x630] ss:$28 sps:$4 sm:$0xff]  }
 0x425   :  { %4954 = vmatprep.subr.bf16.mxu0 %v5751_v14  ;;  %v5829_v13 = vld [vmem:[%s7716_s7 + $0x66c] ss:$28 sps:$4 sm:$0xff]  }
 0x426   :  { %v5827_v14 = vld [vmem:[%s7716_s7 + $0x668] ss:$28 sps:$4 sm:$0xff]  }
 0x427   :  { %4284 = vmatmul.mubr.bf16.vlgmr.msra.gmra.mrb[12].mxu0 %v7174_v26  ;;  %4186 = vmatpush1.bf16.msra.mxu1 %v5748_v11  ;;  %v5832_v11 = vld [vmem:[%s7716_s7 + $0x6a4] ss:$28 sps:$4 sm:$0xff]  }
 0x428   :  { %4955 = vmatpush3.bf16.msra.mxu0 %v5752_v15  ;;  %4323 = vmatprep.mubr.bf16.mxu0 %v7274_v0  ;;  %v5830_v15 = vld [vmem:[%s7716_s7 + $0x6a0] ss:$28 sps:$4 sm:$0xff]  }
 0x429   :  { %4187 = vmatprep.subr.bf16.mxu1 %v5755_v16  ;;  %4956 = vmatprep.subr.bf16.mxu0 %v5756_v20  ;;  %v5835_v16 = vld [vmem:[%s7716_s7 + $0x6dc] ss:$28 sps:$4 sm:$0xff]  }
 0x42a   :  { %v5833_v20 = vld [vmem:[%s7716_s7 + $0x6d8] ss:$28 sps:$4 sm:$0xff]  }
 0x42b   :  { %4188 = vmatpush1.bf16.msra.mxu1 %v5753_v23  ;;  %v7674_v23 = vld [vmem:[%s7721_s8] sm:$0xff] }
 0x42c   :  { %4957 = vmatpush3.bf16.msra.mxu0 %v5757_v25  ;;  %4189 = vmatprep.subr.bf16.mxu1 %v5760_v19  ;;  %v2821_v25 = vrot.slane %v7674_v23, %v6740_v18  ;;  %v2829_v19 = vrot.slane %v7674_v23, %v6837_v4 }
 0x42d   :  { %4958 = vmatprep.subr.bf16.mxu0 %v5761_v27  ;;  %v2825_v27 = vrot.slane %v7674_v23, %v6748_v21 }
 0x42f   :  { %4190 = vmatpush1.bf16.msra.mxu1 %v5758_v28  ;;  %v2833_v28 = vrot.slane %v7674_v23, %v6751_v22 }
 0x430   :  { %4959 = vmatpush3.bf16.msra.mxu0 %v5762_v29  ;;  %4191 = vmatprep.subr.bf16.mxu1 %v5765_v30 }
 0x431   :  { %4960 = vmatprep.subr.bf16.mxu0 %v5766_v31 }
 0x433   :  { %4192 = vmatpush1.bf16.msra.mxu1 %v5763_v32 }
 0x434   :  { %4961 = vmatpush3.bf16.msra.mxu0 %v5767_v33  ;;  %4193 = vmatprep.subr.bf16.mxu1 %v5770_v34 }
 0x435   :  { %4962 = vmatprep.subr.bf16.mxu0 %v5771_v8 }
 0x437   :  { %4194 = vmatpush1.bf16.msra.mxu1 %v5768_v35 }
 0x438   :  { %4963 = vmatpush3.bf16.msra.mxu0 %v5772_v36  ;;  %4195 = vmatprep.subr.bf16.mxu1 %v5775_v37 }
 0x439   :  { %4964 = vmatprep.subr.bf16.mxu0 %v5776_v38 }
 0x43b   :  { %4196 = vmatpush1.bf16.msra.mxu1 %v5773_v39 }
 0x43c   :  { %4965 = vmatpush3.bf16.msra.mxu0 %v5777_v40  ;;  %4197 = vmatprep.subr.bf16.mxu1 %v5780_v41 }
 0x43d   :  { %4966 = vmatprep.subr.bf16.mxu0 %v5781_v42 }
 0x43f   :  { %4198 = vmatpush1.bf16.msra.mxu1 %v5778_v43 }
 0x440   :  { %4967 = vmatpush3.bf16.msra.mxu0 %v5782_v45  ;;  %4199 = vmatprep.subr.bf16.mxu1 %v5785_v46 }
 0x441   :  { %4968 = vmatprep.subr.bf16.mxu0 %v5786_v47 }
 0x443   :  { %4200 = vmatpush1.bf16.msra.mxu1 %v5783_v48 }
 0x444   :  { %4969 = vmatpush3.bf16.msra.mxu0 %v5787_v49  ;;  %4210 = vmatprep.subr.bf16.mxu1 %v5790_v50 }
 0x446   :  { %4202 = vmatmul.mubr.bf16.vlgmr.msra.gmra.mrb[16].mxu1 %v7174_v26  ;;  %v5799_v26 = vld [vmem:[%s7716_s7 + $0x43c] ss:$28 sps:$4 sm:$0xff]  }
 0x447   :  { %4324 = vmatmul.mubr.bf16.vlgmr.msra.gmra.mrb[16].mxu0 %v7380_v44  ;;  %4211 = vmatpush1.bf16.msra.mxu1 %v5788_v51 }
 0x448   :  { %4242 = vmatprep.mubr.bf16.mxu1 %v7274_v0  ;;  %4212 = vmatprep.subr.bf16.mxu1 %v5793_v52  ;;  %v5797_v0 = vld [vmem:[%s7716_s7 + $0x438] ss:$28 sps:$4 sm:$0xff]  }
 0x44b   :  { %4213 = vmatpush1.bf16.msra.mxu1 %v5791_v24 }
 0x44c   :  { %4214 = vmatprep.subr.bf16.mxu1 %v5796_v53 }
 0x44f   :  { %4215 = vmatpush1.bf16.msra.mxu1 %v5794_v54 }
 0x450   :  { %4216 = vmatprep.subr.bf16.mxu1 %v5799_v26 }
 0x453   :  { %4217 = vmatpush1.bf16.msra.mxu1 %v5797_v0 }
 0x454   :  { %4218 = vmatprep.subr.bf16.mxu1 %v5802_v55 }
 0x457   :  { %4219 = vmatpush1.bf16.msra.mxu1 %v5800_v56 }
 0x458   :  { %4220 = vmatprep.subr.bf16.mxu1 %v5805_v57 }
 0x45b   :  { %4221 = vmatpush1.bf16.msra.mxu1 %v5803_v58  ;;  %v2844_v58 = vsub.s32 6, %v6737_v17 }
 0x45c   :  { %4222 = vmatprep.subr.bf16.mxu1 %v5808_v59 }
 0x45d   :  { %v2845_v59 = vrot.slane %v7674_v23, %v2844_v58 }
 0x45f   :  { %4223 = vmatpush1.bf16.msra.mxu1 %v5806_v60 }
 0x460   :  { %4224 = vmatprep.subr.bf16.mxu1 %v5811_v61 }
 0x463   :  { %4225 = vmatpush1.bf16.msra.mxu1 %v5809_v62 }
 0x464   :  { %4226 = vmatprep.subr.bf16.mxu1 %v5814_v63 }
 0x467   :  { %4227 = vmatpush1.bf16.msra.mxu1 %v5812_v1 }
 0x468   :  { %4228 = vmatprep.subr.bf16.mxu1 %v5817_v2 }
 0x46b   :  { %4229 = vmatpush1.bf16.msra.mxu1 %v5815_v3 }
 0x46c   :  { %4230 = vmatprep.subr.bf16.mxu1 %v5820_v5 }
 0x46f   :  { %4231 = vmatpush1.bf16.msra.mxu1 %v5818_v6 }
 0x470   :  { %4232 = vmatprep.subr.bf16.mxu1 %v5823_v7 }
 0x473   :  { %4233 = vmatpush1.bf16.msra.mxu1 %v5821_v9 }
 0x474   :  { %4234 = vmatprep.subr.bf16.mxu1 %v5826_v10 }
 0x477   :  { %4235 = vmatpush1.bf16.msra.mxu1 %v5824_v12  ;;  %v2836_v12 = vsub.s32 4, %v6737_v17 }
 0x478   :  { %4236 = vmatprep.subr.bf16.mxu1 %v5829_v13  ;;  %v2840_v13 = vsub.s32 5, %v6737_v17 }
 0x47b   :  { %4237 = vmatpush1.bf16.msra.mxu1 %v5827_v14  ;;  %v2837_v14 = vrot.slane %v7674_v23, %v2836_v12 }
 0x47c   :  { %4238 = vmatprep.subr.bf16.mxu1 %v5832_v11  ;;  %v2841_v11 = vrot.slane %v7674_v23, %v2840_v13 }
 0x47f   :  { %4239 = vmatpush1.bf16.msra.mxu1 %v5830_v15 }
 0x480   :  { %4240 = vmatprep.subr.bf16.mxu1 %v5835_v16 }
 0x483   :  { %4241 = vmatpush1.bf16.msra.mxu1 %v5833_v20 }
 0x486   :  { %4243 = vmatmul.mubr.bf16.vlgmr.msra.gmra.mrb[16].mxu1 %v7380_v44 }
 0x4d9   :  { %v4080_v29 = vpop.f32.mrb[12].mxu1  ;;  %v4162_v30 = vpop.f32.mrb[8].mxu0 }
 0x4da   :  { %v4982_v44 = vadd.f32 %v4080_v29, %v2821_v25  ;;  %v4984_v31 = vadd.f32 %v4162_v30, %v2829_v19  ;;  %v4082_v32 = vpop.f32.mrb[13].mxu1  ;;  %v4164_v33 = vpop.f32.mrb[9].mxu0 }
 0x4db   :  { %v4983_v34 = vadd.f32 %v4082_v32, %v2825_v27  ;;  %v4985_v8 = vadd.f32 %v4164_v33, %v2833_v28  ;;  %v4084_v35 = vpop.f32.mrb[14].mxu1  ;;  %v4166_v36 = vpop.f32.mrb[10].mxu0 }
 0x4dc   :  { %v4331_v18 = vsub.f32 0.0, %v4982_v44  ;;  %v4333_v37 = vsub.f32 0.0, %v4984_v31  ;;  %v4085_v38 = vpop.f32.mrb[15].mxu1  ;;  %v4167_v4 = vpop.f32.mrb[11].mxu0 }
 0x4dd   :  { %v4332_v39 = vsub.f32 0.0, %v4983_v34  ;;  %v4334_v40 = vsub.f32 0.0, %v4985_v8 }
 0x4de   :  { %v4338_v21 = vmul.f32 1.442695, %v4331_v18  ;;  %v4342_v41 = vmul.f32 1.442695, %v4333_v37 }
 0x4df   :  { %v4340_v42 = vmul.f32 1.442695, %v4332_v39  ;;  %v4344_v22 = vmul.f32 1.442695, %v4334_v40 }
 0x4e0   :  { %5838 = vpow2.f32 %v4338_v21 }
 0x4e1   :  { %5840 = vpow2.f32 %v4342_v41 }
 0x4e2   :  { %5842 = vpow2.f32 %v4340_v42 }
 0x4e3   :  { %5844 = vpow2.f32 %v4344_v22 }
 0x4ea   :  { %v5839_v43 = vpop.eup %5838 }
 0x4eb   :  { %v5841_v45 = vpop.eup %5840  ;;  %v4352_v46 = vadd.f32 1.0, %v5839_v43 }
 0x4ec   :  { %v5843_v47 = vpop.eup %5842  ;;  %v4354_v48 = vadd.f32 1.0, %v5841_v45 }
 0x4ed   :  { %v5845_v49 = vpop.eup %5844  ;;  %5846 = vrcp.f32 %v4352_v46  ;;  %v4353_v50 = vadd.f32 1.0, %v5843_v47 }
 0x4ee   :  { %5848 = vrcp.f32 %v4354_v48  ;;  %v4355_v51 = vadd.f32 1.0, %v5845_v49 }
 0x4ef   :  { %5850 = vrcp.f32 %v4353_v50 }
 0x4f0   :  { %5852 = vrcp.f32 %v4355_v51 }
 0x4f7   :  { %v5847_v52 = vpop.eup %5846 }
 0x4f8   :  { %v5849_v24 = vpop.eup %5848  ;;  %4366 = vst [vmem:[%s7722_s10] sm:$0xff] %v5847_v52 }
 0x4f9   :  { %v5851_v53 = vpop.eup %5850  ;;  %4368 = vst [vmem:[%s7722_s10 + $0x10] sm:$0xff] %v5849_v24 }
 0x4fa   :  { %v5853_v54 = vpop.eup %5852  ;;  %4367 = vst [vmem:[%s7722_s10 + $0x8] sm:$0xff] %v5851_v53  ;;  %v4948_v26 = vpop.f32.mrb[12].mxu0 }
 0x4fb   :  { %4369 = vst [vmem:[%s7722_s10 + $0x18] sm:$0xff] %v5853_v54  ;;  %v4949_v0 = vpop.f32.mrb[13].mxu0 }
 0x4fc   :  { %v4950_v55 = vadd.f32 %v4949_v0, %v4948_v26  ;;  %v4951_v56 = vpop.f32.mrb[14].mxu0 }
 0x4fd   :  { %v4952_v57 = vpop.f32.mrb[15].mxu0 }
 0x4fe   :  { %v4286_v62 = vadd.f32 %v4950_v55, %v2845_v59 }
 0x51a   :  { %v4970_v60 = vpop.f32.mrb[16].mxu0 }
 0x51b   :  { %v4971_v61 = vpop.f32.mrb[17].mxu0 }
 0x51c   :  { %v4972_v63 = vadd.f32 %v4971_v61, %v4970_v60  ;;  %v4973_v1 = vpop.f32.mrb[18].mxu0 }
 0x51d   :  { %v4974_v2 = vpop.f32.mrb[19].mxu0 }
 0x51e   :  { %v4326_v3 = vadd.f32 %v4972_v63, %v4286_v62 }
 0x520   :  { %v4337_v5 = vsub.f32 0.0, %v4326_v3 }
 0x522   :  { %v4350_v6 = vmul.f32 1.442695, %v4337_v5 }
 0x524   :  { %5854 = vpow2.f32 %v4350_v6 }
 0x52e   :  { %v5855_v7 = vpop.eup %5854 }
 0x52f   :  { %v4358_v9 = vadd.f32 1.0, %v5855_v7 }
 0x531   :  { %5856 = vrcp.f32 %v4358_v9 }
 0x53b   :  { %v5857_v10 = vpop.eup %5856 }
 0x53c   :  { %4372 = vst [vmem:[%s7722_s10 + $0x30] sm:$0xff] %v5857_v10 }
 0x559   :  { %v4244_v15 = vpop.f32.mrb[16].mxu1 }
 0x55a   :  { %v4986_v16 = vadd.f32 %v4244_v15, %v2837_v14  ;;  %v4246_v20 = vpop.f32.mrb[17].mxu1 }
 0x55b   :  { %v4987_v25 = vadd.f32 %v4246_v20, %v2841_v11  ;;  %v4248_v19 = vpop.f32.mrb[18].mxu1 }
 0x55c   :  { %v4335_v27 = vsub.f32 0.0, %v4986_v16  ;;  %v4249_v28 = vpop.f32.mrb[19].mxu1 }
 0x55d   :  { %v4336_v29 = vsub.f32 0.0, %v4987_v25 }
 0x55e   :  { %v4346_v30 = vmul.f32 1.442695, %v4335_v27 }
 0x55f   :  { %v4348_v44 = vmul.f32 1.442695, %v4336_v29 }
 0x560   :  { %5858 = vpow2.f32 %v4346_v30 }
 0x561   :  { %5860 = vpow2.f32 %v4348_v44 }
 0x56a   :  { %v5859_v31 = vpop.eup %5858 }
 0x56b   :  { %v5861_v32 = vpop.eup %5860  ;;  %v4356_v33 = vadd.f32 1.0, %v5859_v31 }
 0x56c   :  { %v4357_v17 = vadd.f32 1.0, %v5861_v32 }
 0x56d   :  { %5862 = vrcp.f32 %v4356_v33 }
 0x56e   :  { %5864 = vrcp.f32 %v4357_v17 }
 0x577   :  { %v5863_v34 = vpop.eup %5862 }
 0x578   :  { %v5865_v23 = vpop.eup %5864  ;;  %4370 = vst [vmem:[%s7722_s10 + $0x20] sm:$0xff] %v5863_v34 }
 0x579   :  { %4371 = vst [vmem:[%s7722_s10 + $0x28] sm:$0xff] %v5865_v23 }

</bundles_post_ra>
